<compile_context>
chip_gen: v6e
topology: v6e:2x2x1
jax: 0.10.0
libtpu: 0.0.40
codegen_flags: <defaults>
</compile_context>

<pallas_src>
import functools

import jax
import jax.numpy as jnp
from jax import lax
from jax.experimental import pallas as pl
from jax.experimental.pallas import tpu as pltpu

EPS = 1e-5  # torch.nn.LayerNorm default


def _layernorm(v, w_ref, b_ref):
    # v: (rows, D) float32; w_ref/b_ref: (1, D) refs
    mu = jnp.mean(v, axis=-1, keepdims=True)
    var = jnp.mean((v - mu) ** 2, axis=-1, keepdims=True)
    return (v - mu) * lax.rsqrt(var + EPS) * w_ref[0] + b_ref[0]


def encoder_block_kernel(
    # inputs: per-batch sequence tiles + (constant) weights
    x_ref, h_ref,
    ln_in_w, ln_in_b, ln_h_w, ln_h_b,
    wqkv_x, wqkv_h, bqkv, w_out, b_out,
    ln_out_w, ln_out_b, w1, b1, w2, b2,
    # outputs (row blocks)
    y_ref, hout_ref,
    # scratch: full-sequence Q/K/V + per-row-block head-output buffer
    q_s, k_s, v_s, ho_s,
    *, heads, row_block, qkv_chunk, compute_dtype, gelu_approximate):
    N = x_ref.shape[1]
    D = x_ref.shape[2]
    d = D // heads
    scale = float(D / heads) ** (-0.5)
    r = pl.program_id(1)
    cd = compute_dtype

    # ---- once per batch: LayerNorms + QKV projection for all rows --------
    # Chunked over rows to bound the r==0 VMEM peak; q/k/v are written
    # straight into scratch (no (N,3D) temp); attention scale folded into Q.
    @pl.when(r == 0)
    def _compute_qkv():
        @pl.loop(0, N // qkv_chunk)
        def _(c):
            o = pl.multiple_of(c * qkv_chunk, qkv_chunk)
            xc = x_ref[0, pl.ds(o, qkv_chunk), :].astype(jnp.float32)
            hc = h_ref[0, pl.ds(o, qkv_chunk), :].astype(jnp.float32)
            ln_x = _layernorm(xc, ln_in_w, ln_in_b).astype(cd)
            ln_h = _layernorm(hc, ln_h_w, ln_h_b).astype(cd)
            for idx, dst in enumerate((q_s, k_s, v_s)):
                cols = slice(idx * D, (idx + 1) * D)   # lane-aligned (mult. of D)
                acc = jnp.dot(ln_x, wqkv_x[:, cols],
                              preferred_element_type=jnp.float32)
                acc = acc + jnp.dot(ln_h, wqkv_h[:, cols],
                                    preferred_element_type=jnp.float32)
                acc = acc + bqkv[0, cols]
                if idx == 0:
                    acc = acc * scale                  # fold scale into Q once
                dst[pl.ds(o, qkv_chunk), :] = acc.astype(cd)

    # ---- per row block: multi-head attention ------------------------------
    off = pl.multiple_of(r * row_block, row_block)
    q_rows = q_s[pl.ds(off, row_block), :]             # (rows, D) bf16, pre-scaled
    k_all = k_s[...]                                   # (N, D)    bf16
    v_all = v_s[...]                                   # (N, D)    bf16

    dn = (((1,), (1,)), ((), ()))                      # contract last dims (q @ k^T)
    for hi in range(heads):
        sl = slice(hi * d, (hi + 1) * d)
        sim = lax.dot_general(q_rows[:, sl], k_all[:, sl], dn,
                              preferred_element_type=jnp.float32)      # (rows, N)
        sim = sim - jnp.max(sim, axis=-1, keepdims=True)
        p = jnp.exp(sim)
        denom = jnp.sum(p, axis=-1, keepdims=True)                     # (rows, 1)
        oh = jnp.dot(p.astype(cd), v_all[:, sl],
                     preferred_element_type=jnp.float32)               # (rows, d)
        # normalize the small PV output, not the (rows, N) probability matrix
        oh = oh * pl.reciprocal(denom, approx=True)
        ho_s[:, sl] = oh.astype(cd)

    # single full-depth out-projection: contraction over D (not head_dim)
    attn = jnp.dot(ho_s[...], w_out[...],
                   preferred_element_type=jnp.float32) + b_out[0]      # (rows, D)

    # ---- residuals + MLP (dropout = identity in eval mode) -----------------
    x_rows = x_ref[0, pl.ds(off, row_block), :].astype(jnp.float32)
    h_rows = h_ref[0, pl.ds(off, row_block), :].astype(jnp.float32)
    x2 = attn + x_rows
    ln_o = _layernorm(x2, ln_out_w, ln_out_b).astype(cd)
    hid = jnp.dot(ln_o, w1[...], preferred_element_type=jnp.float32) + b1[0]
    hid = jax.nn.gelu(hid, approximate=gelu_approximate).astype(cd)
    mlp = jnp.dot(hid, w2[...], preferred_element_type=jnp.float32) + b2[0]

    y_ref[0] = (mlp + x2).astype(y_ref.dtype)
    hout_ref[0] = (attn + h_rows).astype(hout_ref.dtype)


def encoder1d_block(x, h, params, *, heads, row_block=None, qkv_chunk=None,
                    compute_dtype=jnp.bfloat16, gelu_approximate=True,
                    single_buffer_weights=True,
                    vmem_limit_bytes=48 * 1024 * 1024):
    B, N, D = x.shape
    assert D % heads == 0, "embed dim must be divisible by heads"
    if row_block is None:
        row_block = N if N <= 256 else 256
    assert N % row_block == 0
    if row_block != N:
        assert row_block % 8 == 0, "row_block must be a multiple of 8"
    if qkv_chunk is None:
        qkv_chunk = row_block
    assert N % qkv_chunk == 0
    if qkv_chunk != N:
        assert qkv_chunk % 8 == 0, "qkv_chunk must be a multiple of 8"
    n_row_blocks = N // row_block
    cd = compute_dtype

    # Resident sequences in the compute dtype: halves VMEM + DMA bytes.
    x_in = x.astype(cd)
    h_in = h.astype(cd)

    # Pre-sum the two QKV biases; matmul weights pre-cast to bf16 (halves
    # DMA/VMEM); biases and LN affine params stay f32.
    bqkv = (params["bqkv_x"] + params["bqkv_h"]).astype(jnp.float32)
    weights = [
        params["ln_in_w"], params["ln_in_b"],
        params["ln_h_w"], params["ln_h_b"],
        params["wqkv_x"].astype(cd), params["wqkv_h"].astype(cd), bqkv,
        params["w_out"].astype(cd), params["b_out"],
        params["ln_out_w"], params["ln_out_b"],
        params["w1"].astype(cd), params["b1"],
        params["w2"].astype(cd), params["b2"],
    ]

    def weight_spec(arr):
        nd = arr.ndim
        idx = lambda b, r, _nd=nd: (0,) * _nd          # grid-invariant
        if single_buffer_weights:
            # Constant across the grid -> second pipeline buffer is wasted VMEM.
            return pl.BlockSpec(arr.shape, idx, pipeline_mode=pl.Buffered(1))
        return pl.BlockSpec(arr.shape, idx)

    seq_in_spec = pl.BlockSpec((1, N, D), lambda b, r: (b, 0, 0))           # resident per batch
    row_out_spec = pl.BlockSpec((1, row_block, D), lambda b, r: (b, r, 0))  # per row block

    kernel = functools.partial(
        encoder_block_kernel, heads=heads, row_block=row_block,
        qkv_chunk=qkv_chunk, compute_dtype=cd,
        gelu_approximate=gelu_approximate)

    call = pl.pallas_call(
        kernel,
        out_shape=(jax.ShapeDtypeStruct((B, N, D), x.dtype),
                   jax.ShapeDtypeStruct((B, N, D), x.dtype)),
        grid_spec=pltpu.PrefetchScalarGridSpec(
            num_scalar_prefetch=0,
            grid=(B, n_row_blocks),
            in_specs=[seq_in_spec, seq_in_spec] + [weight_spec(w) for w in weights],
            out_specs=[row_out_spec, row_out_spec],
            scratch_shapes=[pltpu.VMEM((N, D), cd),           # Q (pre-scaled)
                            pltpu.VMEM((N, D), cd),           # K
                            pltpu.VMEM((N, D), cd),           # V
                            pltpu.VMEM((row_block, D), cd)],  # head outputs
        ),
        compiler_params=pltpu.CompilerParams(
            # row axis carries the per-batch Q/K/V scratch -> "arbitrary"
            dimension_semantics=("parallel", "arbitrary"),
            vmem_limit_bytes=vmem_limit_bytes),
    )
    # TODO(synk): for v7x small-batch (2 TCs), hoist the QKV projection into a
    # separate call so the row axis has no r==0 scratch dependency and both
    # grid axes can be marked "parallel".
    return call(x_in, h_in, *weights)


def reference(x, h, p, heads):
    """Pure-JAX f32 reference matching the PyTorch module (eval mode)."""
    def ln(v, w, b):
        mu = jnp.mean(v, -1, keepdims=True)
        var = jnp.mean((v - mu) ** 2, -1, keepdims=True)
        return (v - mu) / jnp.sqrt(var + EPS) * w[0] + b[0]

    B, N, D = x.shape
    d = D // heads
    scale = (D / heads) ** (-0.5)
    ln_x = ln(x, p["ln_in_w"], p["ln_in_b"])
    ln_h = ln(h, p["ln_h_w"], p["ln_h_b"])
    qkv = (ln_x @ p["wqkv_x"] + p["bqkv_x"][0]) + (ln_h @ p["wqkv_h"] + p["bqkv_h"][0])
    q, k, v = jnp.split(qkv, 3, axis=-1)

    def split_heads(t):
        return t.reshape(B, N, heads, d).transpose(0, 2, 1, 3)

    q, k, v = map(split_heads, (q, k, v))
    sim = jnp.einsum("bhid,bhjd->bhij", q, k) * scale
    attn_p = jax.nn.softmax(sim, axis=-1)
    o = jnp.einsum("bhij,bhjd->bhid", attn_p, v)
    o = o.transpose(0, 2, 1, 3).reshape(B, N, D)
    attn = o @ p["w_out"] + p["b_out"][0]
    x2 = attn + x
    hid = jax.nn.gelu(ln(x2, p["ln_out_w"], p["ln_out_b"]) @ p["w1"] + p["b1"][0],
                      approximate=False)   # torch nn.GELU default = exact erf
    y = hid @ p["w2"] + p["b2"][0] + x2
    return y, attn + h


if __name__ == "__main__":
    B, N, D, HEADS, MLP = 2, 16, 32, 4, 64
    ROW_BLOCK = 8                         # grid = (B, N // ROW_BLOCK) = (2, 2)
    key = jax.random.PRNGKey(0)
    ks = jax.random.split(key, 24)

    def rnd(k, shape, s=0.05):
        return jax.random.normal(k, shape, jnp.float32) * s

    params = {
        "ln_in_w": 1.0 + rnd(ks[12], (1, D), 0.1), "ln_in_b": rnd(ks[13], (1, D), 0.1),
        "ln_h_w": 1.0 + rnd(ks[14], (1, D), 0.1), "ln_h_b": rnd(ks[15], (1, D), 0.1),
        "ln_out_w": 1.0 + rnd(ks[16], (1, D), 0.1), "ln_out_b": rnd(ks[17], (1, D), 0.1),
        # Linear weights stored as (in, out), i.e. transposed vs. torch's (out, in)
        "wqkv_x": rnd(ks[0], (D, 3 * D)), "bqkv_x": rnd(ks[1], (1, 3 * D)),
        "wqkv_h": rnd(ks[2], (D, 3 * D)), "bqkv_h": rnd(ks[3], (1, 3 * D)),
        "w_out": rnd(ks[4], (D, D)), "b_out": rnd(ks[5], (1, D)),
        "w1": rnd(ks[6], (D, MLP)), "b1": rnd(ks[7], (1, MLP)),
        "w2": rnd(ks[8], (MLP, D)), "b2": rnd(ks[9], (1, D)),
    }

    x = jax.random.normal(ks[10], (B, N, D), jnp.float32)
    h = jax.random.normal(ks[11], (B, N, D), jnp.float32)

    kwargs = dict(heads=HEADS, row_block=ROW_BLOCK)
    try:
        y, h_out = encoder1d_block(x, h, params, **kwargs)
        jax.block_until_ready((y, h_out))
    except Exception as e:
        # Only retry (with default double-buffered weights) if the failure is
        # specifically about single-buffered (Buffered(1)) input specs;
        # unrelated failures (e.g. VMEM OOM) are re-raised.
        msg = str(e)
        if ("Buffered" not in msg and "pipeline_mode" not in msg
                and "buffer_count" not in msg):
            raise
        y, h_out = encoder1d_block(x, h, params, single_buffer_weights=False,
                                   **kwargs)
        jax.block_until_ready((y, h_out))

    y_ref, h_ref_out = reference(x, h, params, HEADS)
    # bf16 MXU operands + bf16 resident x/h + approx reciprocal + tanh-GELU
    # => bf16-appropriate tolerance vs the f32 exact reference.
    assert jnp.allclose(y, y_ref, atol=2e-2, rtol=2e-2), "y mismatch"
    assert jnp.allclose(h_out, h_ref_out, atol=2e-2, rtol=2e-2), "h mismatch"

    print("KERNEL_OK")
</pallas_src>

<mosaic_0001>
module attributes {stable_mosaic.version = 11 : i64} {
  func.func @encoder_block_kernel(%arg0: i32, %arg1: i32, %arg2: memref<1x16x32xbf16, #tpu.memory_space<vmem>>, %arg3: memref<1x16x32xbf16, #tpu.memory_space<vmem>>, %arg4: memref<1x32xf32, #tpu.memory_space<vmem>>, %arg5: memref<1x32xf32, #tpu.memory_space<vmem>>, %arg6: memref<1x32xf32, #tpu.memory_space<vmem>>, %arg7: memref<1x32xf32, #tpu.memory_space<vmem>>, %arg8: memref<32x96xbf16, #tpu.memory_space<vmem>>, %arg9: memref<32x96xbf16, #tpu.memory_space<vmem>>, %arg10: memref<1x96xf32, #tpu.memory_space<vmem>>, %arg11: memref<32x32xbf16, #tpu.memory_space<vmem>>, %arg12: memref<1x32xf32, #tpu.memory_space<vmem>>, %arg13: memref<1x32xf32, #tpu.memory_space<vmem>>, %arg14: memref<1x32xf32, #tpu.memory_space<vmem>>, %arg15: memref<32x64xbf16, #tpu.memory_space<vmem>>, %arg16: memref<1x64xf32, #tpu.memory_space<vmem>>, %arg17: memref<64x32xbf16, #tpu.memory_space<vmem>>, %arg18: memref<1x32xf32, #tpu.memory_space<vmem>>, %arg19: memref<1x8x32xf32, #tpu.memory_space<vmem>>, %arg20: memref<1x8x32xf32, #tpu.memory_space<vmem>>, %arg21: memref<16x32xbf16, #tpu.memory_space<vmem>>, %arg22: memref<16x32xbf16, #tpu.memory_space<vmem>>, %arg23: memref<16x32xbf16, #tpu.memory_space<vmem>>, %arg24: memref<8x32xbf16, #tpu.memory_space<vmem>>) attributes {dimension_semantics = [#tpu.dimension_semantics<parallel>, #tpu.dimension_semantics<arbitrary>], iteration_bounds = array<i64: 2, 2>, scalar_prefetch = 0 : i64, scratch_operands = 4 : i64, tpu.core_type = #tpu.core_type<tc>, window_params = [{transform_indices = @transform_0, window_bounds = array<i64: 1, 16, 32>}, {transform_indices = @transform_1, window_bounds = array<i64: 1, 16, 32>}, {pipeline_mode = #tpu.pipeline_mode<synchronous>, transform_indices = @transform_2, window_bounds = array<i64: 1, 32>}, {pipeline_mode = #tpu.pipeline_mode<synchronous>, transform_indices = @transform_3, window_bounds = array<i64: 1, 32>}, {pipeline_mode = #tpu.pipeline_mode<synchronous>, transform_indices = @transform_4, window_bounds = array<i64: 1, 32>}, {pipeline_mode = #tpu.pipeline_mode<synchronous>, transform_indices = @transform_5, window_bounds = array<i64: 1, 32>}, {pipeline_mode = #tpu.pipeline_mode<synchronous>, transform_indices = @transform_6, window_bounds = array<i64: 32, 96>}, {pipeline_mode = #tpu.pipeline_mode<synchronous>, transform_indices = @transform_7, window_bounds = array<i64: 32, 96>}, {pipeline_mode = #tpu.pipeline_mode<synchronous>, transform_indices = @transform_8, window_bounds = array<i64: 1, 96>}, {pipeline_mode = #tpu.pipeline_mode<synchronous>, transform_indices = @transform_9, window_bounds = array<i64: 32, 32>}, {pipeline_mode = #tpu.pipeline_mode<synchronous>, transform_indices = @transform_10, window_bounds = array<i64: 1, 32>}, {pipeline_mode = #tpu.pipeline_mode<synchronous>, transform_indices = @transform_11, window_bounds = array<i64: 1, 32>}, {pipeline_mode = #tpu.pipeline_mode<synchronous>, transform_indices = @transform_12, window_bounds = array<i64: 1, 32>}, {pipeline_mode = #tpu.pipeline_mode<synchronous>, transform_indices = @transform_13, window_bounds = array<i64: 32, 64>}, {pipeline_mode = #tpu.pipeline_mode<synchronous>, transform_indices = @transform_14, window_bounds = array<i64: 1, 64>}, {pipeline_mode = #tpu.pipeline_mode<synchronous>, transform_indices = @transform_15, window_bounds = array<i64: 64, 32>}, {pipeline_mode = #tpu.pipeline_mode<synchronous>, transform_indices = @transform_16, window_bounds = array<i64: 1, 32>}, {transform_indices = @transform_17, window_bounds = array<i64: 1, 8, 32>}, {transform_indices = @transform_18, window_bounds = array<i64: 1, 8, 32>}]} {
    %c0_i32 = arith.constant 0 : i32
    %0 = arith.cmpi eq, %arg1, %c0_i32 : i32
    %1 = arith.extui %0 : i1 to i32
    %c0_i32_0 = arith.constant 0 : i32
    %2 = arith.cmpi ne, %1, %c0_i32_0 : i32
    scf.if %2 {
      %c0_i32_65 = arith.constant 0 : i32
      %c2_i32 = arith.constant 2 : i32
      %163 = arith.addi %c0_i32_65, %c2_i32 : i32
      %c1_i32 = arith.constant 1 : i32
      scf.for %arg25 = %c0_i32_65 to %163 step %c1_i32  : i32 {
        %c1_i32_67 = arith.constant 1 : i32
        %164 = arith.muli %arg25, %c1_i32_67 : i32
        %c0_i32_68 = arith.constant 0 : i32
        %165 = arith.addi %c0_i32_68, %164 : i32
        %c8_i32_69 = arith.constant 8 : i32
        %166 = arith.muli %165, %c8_i32_69 : i32
        %167 = tpu.assume_multiple %166, 8 : i32
        %c0_70 = arith.constant 0 : index
        %168 = arith.index_cast %167 : i32 to index
        %c0_71 = arith.constant 0 : index
        %169 = vector.load %arg2[%c0_70, %168, %c0_71] : memref<1x16x32xbf16, #tpu.memory_space<vmem>>, vector<1x8x32xbf16>
        %170 = vector.shape_cast %169 : vector<1x8x32xbf16> to vector<8x32xbf16>
        %171 = arith.extf %170 : vector<8x32xbf16> to vector<8x32xf32>
        %c0_72 = arith.constant 0 : index
        %172 = arith.index_cast %167 : i32 to index
        %c0_73 = arith.constant 0 : index
        %173 = vector.load %arg3[%c0_72, %172, %c0_73] : memref<1x16x32xbf16, #tpu.memory_space<vmem>>, vector<1x8x32xbf16>
        %174 = vector.shape_cast %173 : vector<1x8x32xbf16> to vector<8x32xbf16>
        %175 = arith.extf %174 : vector<8x32xbf16> to vector<8x32xf32>
        %cst_74 = arith.constant dense<0.000000e+00> : vector<8xf32>
        %176 = vector.multi_reduction <add>, %171, %cst_74 [1] : vector<8x32xf32> to vector<8xf32>
        %177 = vector.shape_cast %176 : vector<8xf32> to vector<8x1xf32>
        %cst_75 = arith.constant 3.200000e+01 : f32
        %178 = vector.broadcast %cst_75 : f32 to vector<8x1xf32>
        %179 = arith.divf %177, %178 : vector<8x1xf32>
        %180 = vector.broadcast %179 : vector<8x1xf32> to vector<8x32xf32>
        %181 = arith.subf %171, %180 : vector<8x32xf32>
        %182 = arith.mulf %181, %181 : vector<8x32xf32>
        %cst_76 = arith.constant dense<0.000000e+00> : vector<8xf32>
        %183 = vector.multi_reduction <add>, %182, %cst_76 [1] : vector<8x32xf32> to vector<8xf32>
        %184 = vector.shape_cast %183 : vector<8xf32> to vector<8x1xf32>
        %cst_77 = arith.constant 3.200000e+01 : f32
        %185 = vector.broadcast %cst_77 : f32 to vector<8x1xf32>
        %186 = arith.divf %184, %185 : vector<8x1xf32>
        %187 = vector.broadcast %179 : vector<8x1xf32> to vector<8x32xf32>
        %188 = arith.subf %171, %187 : vector<8x32xf32>
        %cst_78 = arith.constant 9.99999974E-6 : f32
        %189 = vector.broadcast %cst_78 : f32 to vector<8x1xf32>
        %190 = arith.addf %186, %189 : vector<8x1xf32>
        %191 = math.rsqrt %190 : vector<8x1xf32>
        %192 = vector.broadcast %191 : vector<8x1xf32> to vector<8x32xf32>
        %193 = arith.mulf %188, %192 : vector<8x32xf32>
        %c0_79 = arith.constant 0 : index
        %c0_80 = arith.constant 0 : index
        %194 = vector.load %arg4[%c0_79, %c0_80] : memref<1x32xf32, #tpu.memory_space<vmem>>, vector<1x32xf32>
        %195 = vector.shape_cast %194 : vector<1x32xf32> to vector<32xf32>
        %196 = vector.shape_cast %195 : vector<32xf32> to vector<1x32xf32>
        %197 = vector.broadcast %196 : vector<1x32xf32> to vector<8x32xf32>
        %198 = arith.mulf %193, %197 : vector<8x32xf32>
        %c0_81 = arith.constant 0 : index
        %c0_82 = arith.constant 0 : index
        %199 = vector.load %arg5[%c0_81, %c0_82] : memref<1x32xf32, #tpu.memory_space<vmem>>, vector<1x32xf32>
        %200 = vector.shape_cast %199 : vector<1x32xf32> to vector<32xf32>
        %201 = vector.shape_cast %200 : vector<32xf32> to vector<1x32xf32>
        %202 = vector.broadcast %201 : vector<1x32xf32> to vector<8x32xf32>
        %203 = arith.addf %198, %202 : vector<8x32xf32>
        %204 = arith.truncf %203 : vector<8x32xf32> to vector<8x32xbf16>
        %cst_83 = arith.constant dense<0.000000e+00> : vector<8xf32>
        %205 = vector.multi_reduction <add>, %175, %cst_83 [1] : vector<8x32xf32> to vector<8xf32>
        %206 = vector.shape_cast %205 : vector<8xf32> to vector<8x1xf32>
        %cst_84 = arith.constant 3.200000e+01 : f32
        %207 = vector.broadcast %cst_84 : f32 to vector<8x1xf32>
        %208 = arith.divf %206, %207 : vector<8x1xf32>
        %209 = vector.broadcast %208 : vector<8x1xf32> to vector<8x32xf32>
        %210 = arith.subf %175, %209 : vector<8x32xf32>
        %211 = arith.mulf %210, %210 : vector<8x32xf32>
        %cst_85 = arith.constant dense<0.000000e+00> : vector<8xf32>
        %212 = vector.multi_reduction <add>, %211, %cst_85 [1] : vector<8x32xf32> to vector<8xf32>
        %213 = vector.shape_cast %212 : vector<8xf32> to vector<8x1xf32>
        %cst_86 = arith.constant 3.200000e+01 : f32
        %214 = vector.broadcast %cst_86 : f32 to vector<8x1xf32>
        %215 = arith.divf %213, %214 : vector<8x1xf32>
        %216 = vector.broadcast %208 : vector<8x1xf32> to vector<8x32xf32>
        %217 = arith.subf %175, %216 : vector<8x32xf32>
        %cst_87 = arith.constant 9.99999974E-6 : f32
        %218 = vector.broadcast %cst_87 : f32 to vector<8x1xf32>
        %219 = arith.addf %215, %218 : vector<8x1xf32>
        %220 = math.rsqrt %219 : vector<8x1xf32>
        %221 = vector.broadcast %220 : vector<8x1xf32> to vector<8x32xf32>
        %222 = arith.mulf %217, %221 : vector<8x32xf32>
        %c0_88 = arith.constant 0 : index
        %c0_89 = arith.constant 0 : index
        %223 = vector.load %arg6[%c0_88, %c0_89] : memref<1x32xf32, #tpu.memory_space<vmem>>, vector<1x32xf32>
        %224 = vector.shape_cast %223 : vector<1x32xf32> to vector<32xf32>
        %225 = vector.shape_cast %224 : vector<32xf32> to vector<1x32xf32>
        %226 = vector.broadcast %225 : vector<1x32xf32> to vector<8x32xf32>
        %227 = arith.mulf %222, %226 : vector<8x32xf32>
        %c0_90 = arith.constant 0 : index
        %c0_91 = arith.constant 0 : index
        %228 = vector.load %arg7[%c0_90, %c0_91] : memref<1x32xf32, #tpu.memory_space<vmem>>, vector<1x32xf32>
        %229 = vector.shape_cast %228 : vector<1x32xf32> to vector<32xf32>
        %230 = vector.shape_cast %229 : vector<32xf32> to vector<1x32xf32>
        %231 = vector.broadcast %230 : vector<1x32xf32> to vector<8x32xf32>
        %232 = arith.addf %227, %231 : vector<8x32xf32>
        %233 = arith.truncf %232 : vector<8x32xf32> to vector<8x32xbf16>
        %c0_92 = arith.constant 0 : index
        %c0_93 = arith.constant 0 : index
        %234 = vector.load %arg8[%c0_92, %c0_93] : memref<32x96xbf16, #tpu.memory_space<vmem>>, vector<32x32xbf16>
        %cst_94 = arith.constant dense<0.000000e+00> : vector<8x32xf32>
        %235 = tpu.matmul %204, %234, %cst_94 {dimension_numbers = #tpu.dot_dimension_numbers<[1], [0], [0], [1], [0, 0, 1, 1], [], []>} : vector<8x32xbf16>, vector<32x32xbf16>, vector<8x32xf32> -> vector<8x32xf32>
        %c0_95 = arith.constant 0 : index
        %c0_96 = arith.constant 0 : index
        %236 = vector.load %arg9[%c0_95, %c0_96] : memref<32x96xbf16, #tpu.memory_space<vmem>>, vector<32x32xbf16>
        %cst_97 = arith.constant dense<0.000000e+00> : vector<8x32xf32>
        %237 = tpu.matmul %233, %236, %cst_97 {dimension_numbers = #tpu.dot_dimension_numbers<[1], [0], [0], [1], [0, 0, 1, 1], [], []>} : vector<8x32xbf16>, vector<32x32xbf16>, vector<8x32xf32> -> vector<8x32xf32>
        %238 = arith.addf %235, %237 : vector<8x32xf32>
        %c0_98 = arith.constant 0 : index
        %c0_99 = arith.constant 0 : index
        %239 = vector.load %arg10[%c0_98, %c0_99] : memref<1x96xf32, #tpu.memory_space<vmem>>, vector<1x32xf32>
        %240 = vector.shape_cast %239 : vector<1x32xf32> to vector<32xf32>
        %241 = vector.shape_cast %240 : vector<32xf32> to vector<1x32xf32>
        %242 = vector.broadcast %241 : vector<1x32xf32> to vector<8x32xf32>
        %243 = arith.addf %238, %242 : vector<8x32xf32>
        %cst_100 = arith.constant 0.353553385 : f32
        %244 = vector.broadcast %cst_100 : f32 to vector<8x32xf32>
        %245 = arith.mulf %243, %244 : vector<8x32xf32>
        %246 = arith.truncf %245 : vector<8x32xf32> to vector<8x32xbf16>
        %247 = arith.index_cast %167 : i32 to index
        %c0_101 = arith.constant 0 : index
        %248 = vector.load %arg21[%247, %c0_101] : memref<16x32xbf16, #tpu.memory_space<vmem>>, vector<8x32xbf16>
        tpu.vector_store %arg21[%247, %c0_101], %246 {strides = array<i32>} : memref<16x32xbf16, #tpu.memory_space<vmem>>, vector<8x32xbf16>,
        %c0_102 = arith.constant 0 : index
        %c32 = arith.constant 32 : index
        %249 = vector.load %arg8[%c0_102, %c32] : memref<32x96xbf16, #tpu.memory_space<vmem>>, vector<32x32xbf16>
        %cst_103 = arith.constant dense<0.000000e+00> : vector<8x32xf32>
        %250 = tpu.matmul %204, %249, %cst_103 {dimension_numbers = #tpu.dot_dimension_numbers<[1], [0], [0], [1], [0, 0, 1, 1], [], []>} : vector<8x32xbf16>, vector<32x32xbf16>, vector<8x32xf32> -> vector<8x32xf32>
        %c0_104 = arith.constant 0 : index
        %c32_105 = arith.constant 32 : index
        %251 = vector.load %arg9[%c0_104, %c32_105] : memref<32x96xbf16, #tpu.memory_space<vmem>>, vector<32x32xbf16>
        %cst_106 = arith.constant dense<0.000000e+00> : vector<8x32xf32>
        %252 = tpu.matmul %233, %251, %cst_106 {dimension_numbers = #tpu.dot_dimension_numbers<[1], [0], [0], [1], [0, 0, 1, 1], [], []>} : vector<8x32xbf16>, vector<32x32xbf16>, vector<8x32xf32> -> vector<8x32xf32>
        %253 = arith.addf %250, %252 : vector<8x32xf32>
        %c0_107 = arith.constant 0 : index
        %c32_108 = arith.constant 32 : index
        %254 = vector.load %arg10[%c0_107, %c32_108] : memref<1x96xf32, #tpu.memory_space<vmem>>, vector<1x32xf32>
        %255 = vector.shape_cast %254 : vector<1x32xf32> to vector<32xf32>
        %256 = vector.shape_cast %255 : vector<32xf32> to vector<1x32xf32>
        %257 = vector.broadcast %256 : vector<1x32xf32> to vector<8x32xf32>
        %258 = arith.addf %253, %257 : vector<8x32xf32>
        %259 = arith.truncf %258 : vector<8x32xf32> to vector<8x32xbf16>
        %260 = arith.index_cast %167 : i32 to index
        %c0_109 = arith.constant 0 : index
        %261 = vector.load %arg22[%260, %c0_109] : memref<16x32xbf16, #tpu.memory_space<vmem>>, vector<8x32xbf16>
        tpu.vector_store %arg22[%260, %c0_109], %259 {strides = array<i32>} : memref<16x32xbf16, #tpu.memory_space<vmem>>, vector<8x32xbf16>,
        %c0_110 = arith.constant 0 : index
        %c64 = arith.constant 64 : index
        %262 = vector.load %arg8[%c0_110, %c64] : memref<32x96xbf16, #tpu.memory_space<vmem>>, vector<32x32xbf16>
        %cst_111 = arith.constant dense<0.000000e+00> : vector<8x32xf32>
        %263 = tpu.matmul %204, %262, %cst_111 {dimension_numbers = #tpu.dot_dimension_numbers<[1], [0], [0], [1], [0, 0, 1, 1], [], []>} : vector<8x32xbf16>, vector<32x32xbf16>, vector<8x32xf32> -> vector<8x32xf32>
        %c0_112 = arith.constant 0 : index
        %c64_113 = arith.constant 64 : index
        %264 = vector.load %arg9[%c0_112, %c64_113] : memref<32x96xbf16, #tpu.memory_space<vmem>>, vector<32x32xbf16>
        %cst_114 = arith.constant dense<0.000000e+00> : vector<8x32xf32>
        %265 = tpu.matmul %233, %264, %cst_114 {dimension_numbers = #tpu.dot_dimension_numbers<[1], [0], [0], [1], [0, 0, 1, 1], [], []>} : vector<8x32xbf16>, vector<32x32xbf16>, vector<8x32xf32> -> vector<8x32xf32>
        %266 = arith.addf %263, %265 : vector<8x32xf32>
        %c0_115 = arith.constant 0 : index
        %c64_116 = arith.constant 64 : index
        %267 = vector.load %arg10[%c0_115, %c64_116] : memref<1x96xf32, #tpu.memory_space<vmem>>, vector<1x32xf32>
        %268 = vector.shape_cast %267 : vector<1x32xf32> to vector<32xf32>
        %269 = vector.shape_cast %268 : vector<32xf32> to vector<1x32xf32>
        %270 = vector.broadcast %269 : vector<1x32xf32> to vector<8x32xf32>
        %271 = arith.addf %266, %270 : vector<8x32xf32>
        %272 = arith.truncf %271 : vector<8x32xf32> to vector<8x32xbf16>
        %273 = arith.index_cast %167 : i32 to index
        %c0_117 = arith.constant 0 : index
        %274 = vector.load %arg23[%273, %c0_117] : memref<16x32xbf16, #tpu.memory_space<vmem>>, vector<8x32xbf16>
        tpu.vector_store %arg23[%273, %c0_117], %272 {strides = array<i32>} : memref<16x32xbf16, #tpu.memory_space<vmem>>, vector<8x32xbf16>,
      }
      %c2_i32_66 = arith.constant 2 : i32
    } else {
    }
    %c8_i32 = arith.constant 8 : i32
    %3 = arith.muli %arg1, %c8_i32 : i32
    %4 = tpu.assume_multiple %3, 8 : i32
    %5 = arith.index_cast %4 : i32 to index
    %c0 = arith.constant 0 : index
    %6 = vector.load %arg21[%5, %c0] : memref<16x32xbf16, #tpu.memory_space<vmem>>, vector<8x32xbf16>
    %c0_1 = arith.constant 0 : index
    %c0_2 = arith.constant 0 : index
    %7 = vector.load %arg22[%c0_1, %c0_2] : memref<16x32xbf16, #tpu.memory_space<vmem>>, vector<16x32xbf16>
    %c0_3 = arith.constant 0 : index
    %c0_4 = arith.constant 0 : index
    %8 = vector.load %arg23[%c0_3, %c0_4] : memref<16x32xbf16, #tpu.memory_space<vmem>>, vector<16x32xbf16>
    %9 = vector.extract_strided_slice %6 {offsets = [0, 0], sizes = [8, 8], strides = [1, 1]} : vector<8x32xbf16> to vector<8x8xbf16>
    %10 = vector.extract_strided_slice %7 {offsets = [0, 0], sizes = [16, 8], strides = [1, 1]} : vector<16x32xbf16> to vector<16x8xbf16>
    %cst = arith.constant dense<0.000000e+00> : vector<8x16xf32>
    %11 = tpu.matmul %9, %10, %cst {dimension_numbers = #tpu.dot_dimension_numbers<[1], [1], [0], [0], [0, 0, 1, 0], [], []>} : vector<8x8xbf16>, vector<16x8xbf16>, vector<8x16xf32> -> vector<8x16xf32>
    %cst_5 = arith.constant dense<0xFF800000> : vector<8xf32>
    %12 = vector.multi_reduction <maximumf>, %11, %cst_5 [1] : vector<8x16xf32> to vector<8xf32>
    %13 = vector.shape_cast %12 : vector<8xf32> to vector<8x1xf32>
    %14 = vector.broadcast %13 : vector<8x1xf32> to vector<8x16xf32>
    %15 = arith.subf %11, %14 : vector<8x16xf32>
    %16 = math.exp %15 : vector<8x16xf32>
    %cst_6 = arith.constant dense<0.000000e+00> : vector<8xf32>
    %17 = vector.multi_reduction <add>, %16, %cst_6 [1] : vector<8x16xf32> to vector<8xf32>
    %18 = vector.shape_cast %17 : vector<8xf32> to vector<8x1xf32>
    %19 = arith.truncf %16 : vector<8x16xf32> to vector<8x16xbf16>
    %20 = vector.extract_strided_slice %8 {offsets = [0, 0], sizes = [16, 8], strides = [1, 1]} : vector<16x32xbf16> to vector<16x8xbf16>
    %cst_7 = arith.constant dense<0.000000e+00> : vector<8x8xf32>
    %21 = tpu.matmul %19, %20, %cst_7 {dimension_numbers = #tpu.dot_dimension_numbers<[1], [0], [0], [1], [0, 0, 1, 1], [], []>} : vector<8x16xbf16>, vector<16x8xbf16>, vector<8x8xf32> -> vector<8x8xf32>
    %22 = tpu.reciprocal %18 {approx = true} : vector<8x1xf32> -> vector<8x1xf32>
    %23 = vector.broadcast %22 : vector<8x1xf32> to vector<8x8xf32>
    %24 = arith.mulf %21, %23 : vector<8x8xf32>
    %25 = arith.truncf %24 : vector<8x8xf32> to vector<8x8xbf16>
    %c0_8 = arith.constant 0 : index
    %c0_9 = arith.constant 0 : index
    %26 = vector.load %arg24[%c0_8, %c0_9] : memref<8x32xbf16, #tpu.memory_space<vmem>>, vector<8x8xbf16>
    tpu.vector_store %arg24[%c0_8, %c0_9], %25 {strides = array<i32>} : memref<8x32xbf16, #tpu.memory_space<vmem>>, vector<8x8xbf16>,
    %27 = vector.extract_strided_slice %6 {offsets = [0, 8], sizes = [8, 8], strides = [1, 1]} : vector<8x32xbf16> to vector<8x8xbf16>
    %28 = vector.extract_strided_slice %7 {offsets = [0, 8], sizes = [16, 8], strides = [1, 1]} : vector<16x32xbf16> to vector<16x8xbf16>
    %cst_10 = arith.constant dense<0.000000e+00> : vector<8x16xf32>
    %29 = tpu.matmul %27, %28, %cst_10 {dimension_numbers = #tpu.dot_dimension_numbers<[1], [1], [0], [0], [0, 0, 1, 0], [], []>} : vector<8x8xbf16>, vector<16x8xbf16>, vector<8x16xf32> -> vector<8x16xf32>
    %cst_11 = arith.constant dense<0xFF800000> : vector<8xf32>
    %30 = vector.multi_reduction <maximumf>, %29, %cst_11 [1] : vector<8x16xf32> to vector<8xf32>
    %31 = vector.shape_cast %30 : vector<8xf32> to vector<8x1xf32>
    %32 = vector.broadcast %31 : vector<8x1xf32> to vector<8x16xf32>
    %33 = arith.subf %29, %32 : vector<8x16xf32>
    %34 = math.exp %33 : vector<8x16xf32>
    %cst_12 = arith.constant dense<0.000000e+00> : vector<8xf32>
    %35 = vector.multi_reduction <add>, %34, %cst_12 [1] : vector<8x16xf32> to vector<8xf32>
    %36 = vector.shape_cast %35 : vector<8xf32> to vector<8x1xf32>
    %37 = arith.truncf %34 : vector<8x16xf32> to vector<8x16xbf16>
    %38 = vector.extract_strided_slice %8 {offsets = [0, 8], sizes = [16, 8], strides = [1, 1]} : vector<16x32xbf16> to vector<16x8xbf16>
    %cst_13 = arith.constant dense<0.000000e+00> : vector<8x8xf32>
    %39 = tpu.matmul %37, %38, %cst_13 {dimension_numbers = #tpu.dot_dimension_numbers<[1], [0], [0], [1], [0, 0, 1, 1], [], []>} : vector<8x16xbf16>, vector<16x8xbf16>, vector<8x8xf32> -> vector<8x8xf32>
    %40 = tpu.reciprocal %36 {approx = true} : vector<8x1xf32> -> vector<8x1xf32>
    %41 = vector.broadcast %40 : vector<8x1xf32> to vector<8x8xf32>
    %42 = arith.mulf %39, %41 : vector<8x8xf32>
    %43 = arith.truncf %42 : vector<8x8xf32> to vector<8x8xbf16>
    %c0_14 = arith.constant 0 : index
    %c8 = arith.constant 8 : index
    %44 = vector.load %arg24[%c0_14, %c8] : memref<8x32xbf16, #tpu.memory_space<vmem>>, vector<8x8xbf16>
    tpu.vector_store %arg24[%c0_14, %c8], %43 {strides = array<i32>} : memref<8x32xbf16, #tpu.memory_space<vmem>>, vector<8x8xbf16>,
    %45 = vector.extract_strided_slice %6 {offsets = [0, 16], sizes = [8, 8], strides = [1, 1]} : vector<8x32xbf16> to vector<8x8xbf16>
    %46 = vector.extract_strided_slice %7 {offsets = [0, 16], sizes = [16, 8], strides = [1, 1]} : vector<16x32xbf16> to vector<16x8xbf16>
    %cst_15 = arith.constant dense<0.000000e+00> : vector<8x16xf32>
    %47 = tpu.matmul %45, %46, %cst_15 {dimension_numbers = #tpu.dot_dimension_numbers<[1], [1], [0], [0], [0, 0, 1, 0], [], []>} : vector<8x8xbf16>, vector<16x8xbf16>, vector<8x16xf32> -> vector<8x16xf32>
    %cst_16 = arith.constant dense<0xFF800000> : vector<8xf32>
    %48 = vector.multi_reduction <maximumf>, %47, %cst_16 [1] : vector<8x16xf32> to vector<8xf32>
    %49 = vector.shape_cast %48 : vector<8xf32> to vector<8x1xf32>
    %50 = vector.broadcast %49 : vector<8x1xf32> to vector<8x16xf32>
    %51 = arith.subf %47, %50 : vector<8x16xf32>
    %52 = math.exp %51 : vector<8x16xf32>
    %cst_17 = arith.constant dense<0.000000e+00> : vector<8xf32>
    %53 = vector.multi_reduction <add>, %52, %cst_17 [1] : vector<8x16xf32> to vector<8xf32>
    %54 = vector.shape_cast %53 : vector<8xf32> to vector<8x1xf32>
    %55 = arith.truncf %52 : vector<8x16xf32> to vector<8x16xbf16>
    %56 = vector.extract_strided_slice %8 {offsets = [0, 16], sizes = [16, 8], strides = [1, 1]} : vector<16x32xbf16> to vector<16x8xbf16>
    %cst_18 = arith.constant dense<0.000000e+00> : vector<8x8xf32>
    %57 = tpu.matmul %55, %56, %cst_18 {dimension_numbers = #tpu.dot_dimension_numbers<[1], [0], [0], [1], [0, 0, 1, 1], [], []>} : vector<8x16xbf16>, vector<16x8xbf16>, vector<8x8xf32> -> vector<8x8xf32>
    %58 = tpu.reciprocal %54 {approx = true} : vector<8x1xf32> -> vector<8x1xf32>
    %59 = vector.broadcast %58 : vector<8x1xf32> to vector<8x8xf32>
    %60 = arith.mulf %57, %59 : vector<8x8xf32>
    %61 = arith.truncf %60 : vector<8x8xf32> to vector<8x8xbf16>
    %c0_19 = arith.constant 0 : index
    %c16 = arith.constant 16 : index
    %62 = vector.load %arg24[%c0_19, %c16] : memref<8x32xbf16, #tpu.memory_space<vmem>>, vector<8x8xbf16>
    tpu.vector_store %arg24[%c0_19, %c16], %61 {strides = array<i32>} : memref<8x32xbf16, #tpu.memory_space<vmem>>, vector<8x8xbf16>,
    %63 = vector.extract_strided_slice %6 {offsets = [0, 24], sizes = [8, 8], strides = [1, 1]} : vector<8x32xbf16> to vector<8x8xbf16>
    %64 = vector.extract_strided_slice %7 {offsets = [0, 24], sizes = [16, 8], strides = [1, 1]} : vector<16x32xbf16> to vector<16x8xbf16>
    %cst_20 = arith.constant dense<0.000000e+00> : vector<8x16xf32>
    %65 = tpu.matmul %63, %64, %cst_20 {dimension_numbers = #tpu.dot_dimension_numbers<[1], [1], [0], [0], [0, 0, 1, 0], [], []>} : vector<8x8xbf16>, vector<16x8xbf16>, vector<8x16xf32> -> vector<8x16xf32>
    %cst_21 = arith.constant dense<0xFF800000> : vector<8xf32>
    %66 = vector.multi_reduction <maximumf>, %65, %cst_21 [1] : vector<8x16xf32> to vector<8xf32>
    %67 = vector.shape_cast %66 : vector<8xf32> to vector<8x1xf32>
    %68 = vector.broadcast %67 : vector<8x1xf32> to vector<8x16xf32>
    %69 = arith.subf %65, %68 : vector<8x16xf32>
    %70 = math.exp %69 : vector<8x16xf32>
    %cst_22 = arith.constant dense<0.000000e+00> : vector<8xf32>
    %71 = vector.multi_reduction <add>, %70, %cst_22 [1] : vector<8x16xf32> to vector<8xf32>
    %72 = vector.shape_cast %71 : vector<8xf32> to vector<8x1xf32>
    %73 = arith.truncf %70 : vector<8x16xf32> to vector<8x16xbf16>
    %74 = vector.extract_strided_slice %8 {offsets = [0, 24], sizes = [16, 8], strides = [1, 1]} : vector<16x32xbf16> to vector<16x8xbf16>
    %cst_23 = arith.constant dense<0.000000e+00> : vector<8x8xf32>
    %75 = tpu.matmul %73, %74, %cst_23 {dimension_numbers = #tpu.dot_dimension_numbers<[1], [0], [0], [1], [0, 0, 1, 1], [], []>} : vector<8x16xbf16>, vector<16x8xbf16>, vector<8x8xf32> -> vector<8x8xf32>
    %76 = tpu.reciprocal %72 {approx = true} : vector<8x1xf32> -> vector<8x1xf32>
    %77 = vector.broadcast %76 : vector<8x1xf32> to vector<8x8xf32>
    %78 = arith.mulf %75, %77 : vector<8x8xf32>
    %79 = arith.truncf %78 : vector<8x8xf32> to vector<8x8xbf16>
    %c0_24 = arith.constant 0 : index
    %c24 = arith.constant 24 : index
    %80 = vector.load %arg24[%c0_24, %c24] : memref<8x32xbf16, #tpu.memory_space<vmem>>, vector<8x8xbf16>
    tpu.vector_store %arg24[%c0_24, %c24], %79 {strides = array<i32>} : memref<8x32xbf16, #tpu.memory_space<vmem>>, vector<8x8xbf16>,
    %c0_25 = arith.constant 0 : index
    %c0_26 = arith.constant 0 : index
    %81 = vector.load %arg24[%c0_25, %c0_26] : memref<8x32xbf16, #tpu.memory_space<vmem>>, vector<8x32xbf16>
    %c0_27 = arith.constant 0 : index
    %c0_28 = arith.constant 0 : index
    %82 = vector.load %arg11[%c0_27, %c0_28] : memref<32x32xbf16, #tpu.memory_space<vmem>>, vector<32x32xbf16>
    %cst_29 = arith.constant dense<0.000000e+00> : vector<8x32xf32>
    %83 = tpu.matmul %81, %82, %cst_29 {dimension_numbers = #tpu.dot_dimension_numbers<[1], [0], [0], [1], [0, 0, 1, 1], [], []>} : vector<8x32xbf16>, vector<32x32xbf16>, vector<8x32xf32> -> vector<8x32xf32>
    %c0_30 = arith.constant 0 : index
    %c0_31 = arith.constant 0 : index
    %84 = vector.load %arg12[%c0_30, %c0_31] : memref<1x32xf32, #tpu.memory_space<vmem>>, vector<1x32xf32>
    %85 = vector.shape_cast %84 : vector<1x32xf32> to vector<32xf32>
    %86 = vector.shape_cast %85 : vector<32xf32> to vector<1x32xf32>
    %87 = vector.broadcast %86 : vector<1x32xf32> to vector<8x32xf32>
    %88 = arith.addf %83, %87 : vector<8x32xf32>
    %c0_32 = arith.constant 0 : index
    %89 = arith.index_cast %4 : i32 to index
    %c0_33 = arith.constant 0 : index
    %90 = vector.load %arg2[%c0_32, %89, %c0_33] : memref<1x16x32xbf16, #tpu.memory_space<vmem>>, vector<1x8x32xbf16>
    %91 = vector.shape_cast %90 : vector<1x8x32xbf16> to vector<8x32xbf16>
    %92 = arith.extf %91 : vector<8x32xbf16> to vector<8x32xf32>
    %c0_34 = arith.constant 0 : index
    %93 = arith.index_cast %4 : i32 to index
    %c0_35 = arith.constant 0 : index
    %94 = vector.load %arg3[%c0_34, %93, %c0_35] : memref<1x16x32xbf16, #tpu.memory_space<vmem>>, vector<1x8x32xbf16>
    %95 = vector.shape_cast %94 : vector<1x8x32xbf16> to vector<8x32xbf16>
    %96 = arith.extf %95 : vector<8x32xbf16> to vector<8x32xf32>
    %97 = arith.addf %88, %92 : vector<8x32xf32>
    %cst_36 = arith.constant dense<0.000000e+00> : vector<8xf32>
    %98 = vector.multi_reduction <add>, %97, %cst_36 [1] : vector<8x32xf32> to vector<8xf32>
    %99 = vector.shape_cast %98 : vector<8xf32> to vector<8x1xf32>
    %cst_37 = arith.constant 3.200000e+01 : f32
    %100 = vector.broadcast %cst_37 : f32 to vector<8x1xf32>
    %101 = arith.divf %99, %100 : vector<8x1xf32>
    %102 = vector.broadcast %101 : vector<8x1xf32> to vector<8x32xf32>
    %103 = arith.subf %97, %102 : vector<8x32xf32>
    %104 = arith.mulf %103, %103 : vector<8x32xf32>
    %cst_38 = arith.constant dense<0.000000e+00> : vector<8xf32>
    %105 = vector.multi_reduction <add>, %104, %cst_38 [1] : vector<8x32xf32> to vector<8xf32>
    %106 = vector.shape_cast %105 : vector<8xf32> to vector<8x1xf32>
    %cst_39 = arith.constant 3.200000e+01 : f32
    %107 = vector.broadcast %cst_39 : f32 to vector<8x1xf32>
    %108 = arith.divf %106, %107 : vector<8x1xf32>
    %109 = vector.broadcast %101 : vector<8x1xf32> to vector<8x32xf32>
    %110 = arith.subf %97, %109 : vector<8x32xf32>
    %cst_40 = arith.constant 9.99999974E-6 : f32
    %111 = vector.broadcast %cst_40 : f32 to vector<8x1xf32>
    %112 = arith.addf %108, %111 : vector<8x1xf32>
    %113 = math.rsqrt %112 : vector<8x1xf32>
    %114 = vector.broadcast %113 : vector<8x1xf32> to vector<8x32xf32>
    %115 = arith.mulf %110, %114 : vector<8x32xf32>
    %c0_41 = arith.constant 0 : index
    %c0_42 = arith.constant 0 : index
    %116 = vector.load %arg13[%c0_41, %c0_42] : memref<1x32xf32, #tpu.memory_space<vmem>>, vector<1x32xf32>
    %117 = vector.shape_cast %116 : vector<1x32xf32> to vector<32xf32>
    %118 = vector.shape_cast %117 : vector<32xf32> to vector<1x32xf32>
    %119 = vector.broadcast %118 : vector<1x32xf32> to vector<8x32xf32>
    %120 = arith.mulf %115, %119 : vector<8x32xf32>
    %c0_43 = arith.constant 0 : index
    %c0_44 = arith.constant 0 : index
    %121 = vector.load %arg14[%c0_43, %c0_44] : memref<1x32xf32, #tpu.memory_space<vmem>>, vector<1x32xf32>
    %122 = vector.shape_cast %121 : vector<1x32xf32> to vector<32xf32>
    %123 = vector.shape_cast %122 : vector<32xf32> to vector<1x32xf32>
    %124 = vector.broadcast %123 : vector<1x32xf32> to vector<8x32xf32>
    %125 = arith.addf %120, %124 : vector<8x32xf32>
    %126 = arith.truncf %125 : vector<8x32xf32> to vector<8x32xbf16>
    %c0_45 = arith.constant 0 : index
    %c0_46 = arith.constant 0 : index
    %127 = vector.load %arg15[%c0_45, %c0_46] : memref<32x64xbf16, #tpu.memory_space<vmem>>, vector<32x64xbf16>
    %cst_47 = arith.constant dense<0.000000e+00> : vector<8x64xf32>
    %128 = tpu.matmul %126, %127, %cst_47 {dimension_numbers = #tpu.dot_dimension_numbers<[1], [0], [0], [1], [0, 0, 1, 1], [], []>} : vector<8x32xbf16>, vector<32x64xbf16>, vector<8x64xf32> -> vector<8x64xf32>
    %c0_48 = arith.constant 0 : index
    %c0_49 = arith.constant 0 : index
    %129 = vector.load %arg16[%c0_48, %c0_49] : memref<1x64xf32, #tpu.memory_space<vmem>>, vector<1x64xf32>
    %130 = vector.shape_cast %129 : vector<1x64xf32> to vector<64xf32>
    %131 = vector.shape_cast %130 : vector<64xf32> to vector<1x64xf32>
    %132 = vector.broadcast %131 : vector<1x64xf32> to vector<8x64xf32>
    %133 = arith.addf %128, %132 : vector<8x64xf32>
    %134 = arith.mulf %133, %133 : vector<8x64xf32>
    %135 = arith.mulf %133, %134 : vector<8x64xf32>
    %cst_50 = arith.constant 4.471500e-02 : f32
    %136 = vector.broadcast %cst_50 : f32 to vector<8x64xf32>
    %137 = arith.mulf %136, %135 : vector<8x64xf32>
    %138 = arith.addf %133, %137 : vector<8x64xf32>
    %cst_51 = arith.constant 0.797884583 : f32
    %139 = vector.broadcast %cst_51 : f32 to vector<8x64xf32>
    %140 = arith.mulf %139, %138 : vector<8x64xf32>
    %141 = math.tanh %140 : vector<8x64xf32>
    %cst_52 = arith.constant 1.000000e+00 : f32
    %142 = vector.broadcast %cst_52 : f32 to vector<8x64xf32>
    %143 = arith.addf %142, %141 : vector<8x64xf32>
    %cst_53 = arith.constant 5.000000e-01 : f32
    %144 = vector.broadcast %cst_53 : f32 to vector<8x64xf32>
    %145 = arith.mulf %144, %143 : vector<8x64xf32>
    %146 = arith.mulf %133, %145 : vector<8x64xf32>
    %147 = arith.truncf %146 : vector<8x64xf32> to vector<8x64xbf16>
    %c0_54 = arith.constant 0 : index
    %c0_55 = arith.constant 0 : index
    %148 = vector.load %arg17[%c0_54, %c0_55] : memref<64x32xbf16, #tpu.memory_space<vmem>>, vector<64x32xbf16>
    %cst_56 = arith.constant dense<0.000000e+00> : vector<8x32xf32>
    %149 = tpu.matmul %147, %148, %cst_56 {dimension_numbers = #tpu.dot_dimension_numbers<[1], [0], [0], [1], [0, 0, 1, 1], [], []>} : vector<8x64xbf16>, vector<64x32xbf16>, vector<8x32xf32> -> vector<8x32xf32>
    %c0_57 = arith.constant 0 : index
    %c0_58 = arith.constant 0 : index
    %150 = vector.load %arg18[%c0_57, %c0_58] : memref<1x32xf32, #tpu.memory_space<vmem>>, vector<1x32xf32>
    %151 = vector.shape_cast %150 : vector<1x32xf32> to vector<32xf32>
    %152 = vector.shape_cast %151 : vector<32xf32> to vector<1x32xf32>
    %153 = vector.broadcast %152 : vector<1x32xf32> to vector<8x32xf32>
    %154 = arith.addf %149, %153 : vector<8x32xf32>
    %155 = arith.addf %154, %97 : vector<8x32xf32>
    %c0_59 = arith.constant 0 : index
    %c0_60 = arith.constant 0 : index
    %c0_61 = arith.constant 0 : index
    %156 = vector.load %arg19[%c0_59, %c0_60, %c0_61] : memref<1x8x32xf32, #tpu.memory_space<vmem>>, vector<1x8x32xf32>
    %157 = vector.shape_cast %156 : vector<1x8x32xf32> to vector<8x32xf32>
    %158 = vector.shape_cast %155 : vector<8x32xf32> to vector<1x8x32xf32>
    tpu.vector_store %arg19[%c0_59, %c0_60, %c0_61], %158 {strides = array<i32>} : memref<1x8x32xf32, #tpu.memory_space<vmem>>, vector<1x8x32xf32>,
    %159 = arith.addf %88, %96 : vector<8x32xf32>
    %c0_62 = arith.constant 0 : index
    %c0_63 = arith.constant 0 : index
    %c0_64 = arith.constant 0 : index
    %160 = vector.load %arg20[%c0_62, %c0_63, %c0_64] : memref<1x8x32xf32, #tpu.memory_space<vmem>>, vector<1x8x32xf32>
    %161 = vector.shape_cast %160 : vector<1x8x32xf32> to vector<8x32xf32>
    %162 = vector.shape_cast %159 : vector<8x32xf32> to vector<1x8x32xf32>
    tpu.vector_store %arg20[%c0_62, %c0_63, %c0_64], %162 {strides = array<i32>} : memref<1x8x32xf32, #tpu.memory_space<vmem>>, vector<1x8x32xf32>,
    return
  }
  func.func @transform_0(%arg0: i32, %arg1: i32) -> (i32, i32, i32) {
    %c0_i32 = arith.constant 0 : i32
    %c0_i32_0 = arith.constant 0 : i32
    %c0_i32_1 = arith.constant 0 : i32
    return %arg0, %c0_i32, %c0_i32_0 : i32, i32, i32
  }
  func.func @transform_1(%arg0: i32, %arg1: i32) -> (i32, i32, i32) {
    %c0_i32 = arith.constant 0 : i32
    %c0_i32_0 = arith.constant 0 : i32
    %c0_i32_1 = arith.constant 0 : i32
    return %arg0, %c0_i32, %c0_i32_0 : i32, i32, i32
  }
  func.func @transform_2(%arg0: i32, %arg1: i32) -> (i32, i32) {
    %c0_i32 = arith.constant 0 : i32
    %c0_i32_0 = arith.constant 0 : i32
    %c0_i32_1 = arith.constant 0 : i32
    return %c0_i32, %c0_i32_0 : i32, i32
  }
  func.func @transform_3(%arg0: i32, %arg1: i32) -> (i32, i32) {
    %c0_i32 = arith.constant 0 : i32
    %c0_i32_0 = arith.constant 0 : i32
    %c0_i32_1 = arith.constant 0 : i32
    return %c0_i32, %c0_i32_0 : i32, i32
  }
  func.func @transform_4(%arg0: i32, %arg1: i32) -> (i32, i32) {
    %c0_i32 = arith.constant 0 : i32
    %c0_i32_0 = arith.constant 0 : i32
    %c0_i32_1 = arith.constant 0 : i32
    return %c0_i32, %c0_i32_0 : i32, i32
  }
  func.func @transform_5(%arg0: i32, %arg1: i32) -> (i32, i32) {
    %c0_i32 = arith.constant 0 : i32
    %c0_i32_0 = arith.constant 0 : i32
    %c0_i32_1 = arith.constant 0 : i32
    return %c0_i32, %c0_i32_0 : i32, i32
  }
  func.func @transform_6(%arg0: i32, %arg1: i32) -> (i32, i32) {
    %c0_i32 = arith.constant 0 : i32
    %c0_i32_0 = arith.constant 0 : i32
    %c0_i32_1 = arith.constant 0 : i32
    return %c0_i32, %c0_i32_0 : i32, i32
  }
  func.func @transform_7(%arg0: i32, %arg1: i32) -> (i32, i32) {
    %c0_i32 = arith.constant 0 : i32
    %c0_i32_0 = arith.constant 0 : i32
    %c0_i32_1 = arith.constant 0 : i32
    return %c0_i32, %c0_i32_0 : i32, i32
  }
  func.func @transform_8(%arg0: i32, %arg1: i32) -> (i32, i32) {
    %c0_i32 = arith.constant 0 : i32
    %c0_i32_0 = arith.constant 0 : i32
    %c0_i32_1 = arith.constant 0 : i32
    return %c0_i32, %c0_i32_0 : i32, i32
  }
  func.func @transform_9(%arg0: i32, %arg1: i32) -> (i32, i32) {
    %c0_i32 = arith.constant 0 : i32
    %c0_i32_0 = arith.constant 0 : i32
    %c0_i32_1 = arith.constant 0 : i32
    return %c0_i32, %c0_i32_0 : i32, i32
  }
  func.func @transform_10(%arg0: i32, %arg1: i32) -> (i32, i32) {
    %c0_i32 = arith.constant 0 : i32
    %c0_i32_0 = arith.constant 0 : i32
    %c0_i32_1 = arith.constant 0 : i32
    return %c0_i32, %c0_i32_0 : i32, i32
  }
  func.func @transform_11(%arg0: i32, %arg1: i32) -> (i32, i32) {
    %c0_i32 = arith.constant 0 : i32
    %c0_i32_0 = arith.constant 0 : i32
    %c0_i32_1 = arith.constant 0 : i32
    return %c0_i32, %c0_i32_0 : i32, i32
  }
  func.func @transform_12(%arg0: i32, %arg1: i32) -> (i32, i32) {
    %c0_i32 = arith.constant 0 : i32
    %c0_i32_0 = arith.constant 0 : i32
    %c0_i32_1 = arith.constant 0 : i32
    return %c0_i32, %c0_i32_0 : i32, i32
  }
  func.func @transform_13(%arg0: i32, %arg1: i32) -> (i32, i32) {
    %c0_i32 = arith.constant 0 : i32
    %c0_i32_0 = arith.constant 0 : i32
    %c0_i32_1 = arith.constant 0 : i32
    return %c0_i32, %c0_i32_0 : i32, i32
  }
  func.func @transform_14(%arg0: i32, %arg1: i32) -> (i32, i32) {
    %c0_i32 = arith.constant 0 : i32
    %c0_i32_0 = arith.constant 0 : i32
    %c0_i32_1 = arith.constant 0 : i32
    return %c0_i32, %c0_i32_0 : i32, i32
  }
  func.func @transform_15(%arg0: i32, %arg1: i32) -> (i32, i32) {
    %c0_i32 = arith.constant 0 : i32
    %c0_i32_0 = arith.constant 0 : i32
    %c0_i32_1 = arith.constant 0 : i32
    return %c0_i32, %c0_i32_0 : i32, i32
  }
  func.func @transform_16(%arg0: i32, %arg1: i32) -> (i32, i32) {
    %c0_i32 = arith.constant 0 : i32
    %c0_i32_0 = arith.constant 0 : i32
    %c0_i32_1 = arith.constant 0 : i32
    return %c0_i32, %c0_i32_0 : i32, i32
  }
  func.func @transform_17(%arg0: i32, %arg1: i32) -> (i32, i32, i32) {
    %c0_i32 = arith.constant 0 : i32
    %c0_i32_0 = arith.constant 0 : i32
    return %arg0, %arg1, %c0_i32 : i32, i32, i32
  }
  func.func @transform_18(%arg0: i32, %arg1: i32) -> (i32, i32, i32) {
    %c0_i32 = arith.constant 0 : i32
    %c0_i32_0 = arith.constant 0 : i32
    return %arg0, %arg1, %c0_i32 : i32, i32, i32
  }
}

</mosaic_0001>

<bundles_post_ra>
// kernel: tpu_custom_call.1
= control target key start
LH: loop header
LB: loop body
LE: loop exit
PB: predicated region body
PF: predicated region fallthrough
CT: control target
= control target key end

     0   :  { %s3603_s0 = inlined_call_operand.vmem [shape: bf16[2,16,32], index: 0, kind: input, shape index: {}]   ;;  %s3604_s1 = inlined_call_operand.vmem [shape: bf16[2,16,32], index: 1, kind: input, shape index: {}]   ;;  %s3605_s2 = inlined_call_operand.hbm [shape: f32[1,32], index: 2, kind: input, shape index: {}]   ;;  %s3606_s3 = inlined_call_operand.hbm [shape: f32[1,32], index: 3, kind: input, shape index: {}]   ;;  %s3607_s4 = inlined_call_operand.hbm [shape: f32[1,32], index: 4, kind: input, shape index: {}]   ;;  %s3608_s5 = inlined_call_operand.hbm [shape: f32[1,32], index: 5, kind: input, shape index: {}]   ;;  %s3609_s6 = inlined_call_operand.vmem [shape: bf16[32,96], index: 6, kind: input, shape index: {}]   ;;  %s3610_s7 = inlined_call_operand.hbm [shape: bf16[32,96], index: 7, kind: input, shape index: {}]   ;;  %s3611_s8 = inlined_call_operand.hbm [shape: f32[1,96], index: 8, kind: input, shape index: {}]   ;;  %s3612_s9 = inlined_call_operand.vmem [shape: bf16[32,32], index: 9, kind: input, shape index: {}]   ;;  %s3613_s10 = inlined_call_operand.vmem [shape: f32[1,32], index: 10, kind: input, shape index: {}]   ;;  %s3614_s11 = inlined_call_operand.vmem [shape: f32[1,32], index: 11, kind: input, shape index: {}]   ;;  %s3615_s12 = inlined_call_operand.vmem [shape: f32[1,32], index: 12, kind: input, shape index: {}]   ;;  %s3616_s13 = inlined_call_operand.hbm [shape: bf16[32,64], index: 13, kind: input, shape index: {}]   ;;  %s3617_s14 = inlined_call_operand.vmem [shape: f32[1,64], index: 14, kind: input, shape index: {}]   ;;  %s3618_s15 = inlined_call_operand.vmem [shape: bf16[64,32], index: 15, kind: input, shape index: {}]   ;;  %s3619_s16 = inlined_call_operand.vmem [shape: f32[1,32], index: 16, kind: input, shape index: {}]   ;;  %s3620_s17 = inlined_call_operand.hbm [shape: f32[2,16,32], index: 17, kind: output, shape index: {0}]   ;;  %s3621_s18 = inlined_call_operand.hbm [shape: f32[2,16,32], index: 18, kind: output, shape index: {1}]  }
   0x1   :  { %3635 = sst [smem:[#allocation34_spill]] %s3603_s0 }
   0x2   :  { %3636 = sst [smem:[#allocation35_spill]] %s3604_s1 }
   0x3   :  { %3637 = sst [smem:[#allocation36_spill]] %s3605_s2 }
   0x4   :  { %3638 = sst [smem:[#allocation37_spill]] %s3606_s3 }
   0x5   :  { %3639 = sst [smem:[#allocation38_spill]] %s3607_s4 }
   0x6   :  { %3640 = sst [smem:[#allocation39_spill]] %s3608_s5 }
   0x7   :  { %3641 = sst [smem:[#allocation40_spill]] %s3619_s16 }
   0x8   :  { %3642 = sst [smem:[#allocation41_spill]] %s3620_s17 }
   0x9   :  { %3643 = sst [smem:[#allocation42_spill]] %s3621_s18 }
   0xa   :  { %24 = vsyncpa [#allocation7], 0 }
   0xb   :  { %25 = vsyncpa [#allocation10], 0 }
   0xc   :  { %26 = vsyncpa [#allocation13], 0 }
   0xd   :  { %27 = vsyncpa [#allocation16], 0 }
   0xe   :  { %28 = vsyncpa [#allocation8], 0 }
   0xf   :  { %30 = vsyncpa [#allocation8 + $0x1], 0 }
  0x10   :  { %31 = vsyncpa [#allocation20], 0 }
  0x11   :  { %33 = vsyncpa [#allocation20 + $0x1], 0  ;;  %s3130_s27 = smov 0   ;;  %s3132_s28 = smov 0  }
  0x12   :  { %s3134_s29 = smov 0   ;;  %s3136_s30 = smov 0  }
  0x13   :  { %s3138_s0 = smov 0   ;;  %s3140_s19 = smov 0  }
  0x14   :  { %s3142_s1 = smov 0   ;;  %s3144_s20 = smov 0  }
  0x15 LB: > { %3644 = sst [smem:[#allocation27_spill]] %s2986_s29  ;;  %s2193_s21 = sadd.s32 4294967295, %s3006_s20   ;;  %s3006_s20 = sphi %s3144_s20, %s39_s20   ;;  %s3002_s1 = sphi %s3142_s1, %s3678_s1   ;;  %s2998_s19 = sphi %s3140_s19, %s3677_s19   ;;  %s2994_s0 = sphi %s3138_s0, %s3676_s0   ;;  %s2990_s30 = sphi %s3136_s30, %s3675_s30   ;;  %s2986_s29 = sphi %s3134_s29, %s3674_s29   ;;  %s2982_s28 = sphi %s3132_s28, %s3680_s28   ;;  %s2978_s27 = sphi %s3130_s27, %s3679_s27  }
  0x16   : > { %3645 = sst [smem:[#allocation28_spill]] %s2998_s19  ;;  %s2194_s22 = sadd.s32 4294967294, %s3006_s20  }
  0x17   : > { %3646 = sst [smem:[#allocation29_spill]] %s3002_s1  ;;  %s48_s2 = sadd.s32 1, %s2998_s19 }
  0x18   : > { %s51_s23 = sadd.s32 1, %s3002_s1  ;;  %p49_p0 = scmp.ge.s32.totalorder %s48_s2, 2 }
  0x19   : > { %s427_s24 = sadd.s32 1, %s2986_s29  ;;  %p437_p1 = scmp.ne.s32.totalorder %s2986_s29, %s2982_s28 }
  0x1a   : > { %p438_p2 = scmp.eq.s32.totalorder %s2193_s21, 3  ;;  %s3682_s2 = smov (%p49_p0, %s48_s2), 0 }
  0x1b   : > { %3647 = sst [smem:[#allocation30_spill]] %s3682_s2  ;;  %s3684_s23 = smov (!%p49_p0, %s51_s23), %s3002_s1 }
  0x1c   : > { %s423_s25 = ssub.s32 %s2998_s19, %s3682_s2  ;;  %p3182_p3 = por %p438_p2, %p437_p1 }
  0x1d   : > { %p53_p4 = scmp.ge.s32.totalorder %s3684_s23, 2  ;;  %p443_p5 = scmp.ne.s32.totalorder %s2982_s28, %s2978_s27 }
  0x1e   : > { %s3648_s26 = scalar_select %p3182_p3, 1, 0 }
  0x1f   : > { %p444_p6 = scmp.eq.s32.totalorder %s2194_s22, 3  ;;  %p2195_p7 = scmp.ge.s32.totalorder %s3006_s20, 1 }
  0x20   : > { %s3686_s23 = smov (%p53_p4, %s3684_s23), 0  ;;  %p479_p9 = scmp.lt.s32.totalorder %s3006_s20, 5 }
  0x21   : > { %3649 = sst [smem:[#allocation31_spill]] %s3686_s23  ;;  %p3191_p8 = por %p444_p6, %p443_p5 }
  0x22   : > { %s422_s16 = ssub.s32 %s3002_s1, %s3686_s23  ;;  %p3198_p10 = pnand %p2195_p7, %p479_p9 }
  0x23   : > { %s3650_s17 = scalar_select %p3191_p8, 1, 0 }
  0x24   : > { %s424_s18 = sor.u32 %s423_s25, %s422_s16  ;;  %p3202_p12 = scmp.eq.s32.totalorder %s2193_s21, 0 }
  0x25   : > { %3651 = sst [smem:[#allocation32_spill]] %s3650_s17  ;;  %p425_p11 = scmp.eq.s32.totalorder %s424_s18, 0 }
  0x26   : > { %s3652_s2 = scalar_select %p3198_p10, 1, 0 }
  0x27   : > { %s3653_s19 = scalar_select %p3202_p12, 1, 0 }
  0x28   : > { %p2498_p13 = pneg %p3198_p10  ;;  %s3012_s16 = smov [#allocation9]  }
  0x29   : > { %s3209_s22 = scalar_select %p425_p11, %s2986_s29, %s427_s24  }
  0x2a   : > { %p3213_p0 = pnand %p3202_p12, %p2498_p13  ;;  %s503_s25 = sshll.u32 %s3012_s16, 4  ;;  %s504_s25 = int_to_ptr.vmem [resolvable:$true] %s503_s25 }
  0x2b   : > { %3654 = sst [smem:[#allocation33_spill]] %s3209_s22  ;;  %s3013_s23 = smov [#allocation12]  }
  0x2c   : > { %s525_s18 = sshll.u32 %s3013_s23, 4  ;;  %p3219_p1 = pneg %p3213_p0  ;;  %s526_s18 = int_to_ptr.vmem [resolvable:$true] %s525_s18 }
  0x2d   : > { %s2693_s1 = scalar_lea.vmem %s504_s25, 16  ;;  %s2700_s24 = scalar_lea.vmem %s504_s25, 32 }
  0x2e   : > { %p2694_p2 = scmp.ne.s32.totalorder %s504_s25, %s2693_s1  ;;  %p2701_p6 = scmp.lt.s32.totalorder %s504_s25, %s504_s25 }
  0x2f   : > { %p2702_p7 = scmp.lt.s32.totalorder %s2700_s24, %s2693_s1 }
  0x30   : > { %p2696_p4 = pnand %p2694_p2, %p3219_p1 }
  0x31   : > { %p2703_p9 = por %p2702_p7, %p2701_p6 }
  0x32   : > { %p2697_p5 = pneg %p2696_p4 }
  0x34   : > { %p2704_p11 = pnand %p2703_p9, %p2697_p5 }
  0x36   : > { %2707 = shalt.err (!%p2704_p11)
}
  0x37   : > { %s3657_s3 = sld [smem:[#allocation37_spill]]  ;;  %s2719_s22 = scalar_lea.vmem %s526_s18, 16 }
  0x38   : > { %p2720_p13 = scmp.ne.s32.totalorder %s526_s18, %s2719_s22  ;;  %s2726_s29 = scalar_lea.vmem %s526_s18, 32 }
  0x39   : > { %p2727_p4 = scmp.lt.s32.totalorder %s526_s18, %s526_s18  ;;  %p2728_p3 = scmp.lt.s32.totalorder %s2726_s29, %s2719_s22 }
  0x3a   : > { %p2722_p8 = pnand %p2720_p13, %p3219_p1 }
  0x3b   : > { %p2729_p12 = por %p2728_p3, %p2727_p4 }
  0x3c   : > { %p2723_p2 = pneg %p2722_p8 }
  0x3d   : > { %2504 = dma.hbm_to_vmem [thread:$0]  (!%p3213_p0), %s3657_s3, 16, %s504_s25, [#allocation10]  }
  0x3e   : > { %p2730_p6 = pnand %p2729_p12, %p2723_p2 }
  0x40   : > { %2733 = shalt.err (!%p2730_p6)
}
  0x41   : > { %s3658_s5 = sld [smem:[#allocation39_spill]]  ;;  %s3014_s25 = smov [#allocation15]  }
  0x42   : > { %s552_s23 = sshll.u32 %s3014_s25, 4  ;;  %s553_s23 = int_to_ptr.vmem [resolvable:$true] %s552_s23 }
  0x43   : > { %s2745_s16 = scalar_lea.vmem %s553_s23, 16  ;;  %s2752_s3 = scalar_lea.vmem %s553_s23, 32 }
  0x44   : > { %p2746_p5 = scmp.ne.s32.totalorder %s553_s23, %s2745_s16  ;;  %p2753_p9 = scmp.lt.s32.totalorder %s553_s23, %s553_s23 }
  0x45   : > { %p2754_p3 = scmp.lt.s32.totalorder %s2752_s3, %s2745_s16 }
  0x46   : > { %p2748_p8 = pnand %p2746_p5, %p3219_p1 }
  0x47   : > { %2510 = dma.hbm_to_vmem [thread:$0]  (!%p3213_p0), %s3658_s5, 16, %s526_s18, [#allocation13]  }
  0x48   : > { %p2749_p7 = pneg %p2748_p8  ;;  %p2755_p12 = por %p2754_p3, %p2753_p9 }
  0x4a   : > { %p2756_p11 = pnand %p2755_p12, %p2749_p7 }
  0x4c   : > { %2759 = shalt.err (!%p2756_p11)
}
  0x4d   : > { %2516 = dma.hbm_to_vmem [thread:$0]  (!%p3213_p0), %s3611_s8, 16, %s553_s23, [#allocation16]  }
  0x4e   : > { %s3015_s18 = smov [#allocation6]   ;;  %s3016_s24 = smov [#allocation11]  }
  0x4f   : > { %s492_s1 = sshll.u32 %s3015_s18, 4  ;;  %s514_s25 = sshll.u32 %s3016_s24, 4  ;;  %s493_s1 = int_to_ptr.vmem [resolvable:$true] %s492_s1  ;;  %s515_s25 = int_to_ptr.vmem [resolvable:$true] %s514_s25 }
  0x50   : > { %s2771_s5 = scalar_lea.vmem %s493_s1, 16  ;;  %s2778_s3 = scalar_lea.vmem %s493_s1, 32 }
  0x51   : > { %p2772_p13 = scmp.ne.s32.totalorder %s493_s1, %s2771_s5  ;;  %p2779_p6 = scmp.lt.s32.totalorder %s493_s1, %s493_s1 }
  0x52   : > { %p2780_p5 = scmp.lt.s32.totalorder %s2778_s3, %s2771_s5 }
  0x53   : > { %p2774_p2 = pnand %p2772_p13, %p3219_p1 }
  0x54   : > { %p2781_p8 = por %p2780_p5, %p2779_p6 }
  0x55   : > { %p2775_p4 = pneg %p2774_p2 }
  0x57   : > { %p2782_p7 = pnand %p2781_p8, %p2775_p4 }
  0x59   : > { %2785 = shalt.err (!%p2782_p7)
}
  0x5a   : > { %s3659_s29 = sld [smem:[#allocation36_spill]]  ;;  %s2797_s22 = scalar_lea.vmem %s515_s25, 16 }
  0x5b   : > { %p2798_p9 = scmp.ne.s32.totalorder %s515_s25, %s2797_s22  ;;  %s2804_s18 = scalar_lea.vmem %s515_s25, 32 }
  0x5c   : > { %p2805_p11 = scmp.lt.s32.totalorder %s515_s25, %s515_s25  ;;  %p2806_p13 = scmp.lt.s32.totalorder %s2804_s18, %s2797_s22 }
  0x5d   : > { %p2800_p3 = pnand %p2798_p9, %p3219_p1 }
  0x5e   : > { %p2807_p2 = por %p2806_p13, %p2805_p11 }
  0x5f   : > { %p2801_p12 = pneg %p2800_p3 }
  0x60   : > { %2501 = dma.hbm_to_vmem [thread:$0]  (!%p3213_p0), %s3659_s29, 16, %s493_s1, [#allocation7]  }
  0x61   : > { %p2808_p10 = pnand %p2807_p2, %p2801_p12 }
  0x63   : > { %2811 = shalt.err (!%p2808_p10)
}
  0x64   : > { %s3660_s4 = sld [smem:[#allocation38_spill]]  ;;  %s3017_s3 = smov [#allocation14]  }
  0x65   : > { %s538_s1 = sshll.u32 %s3017_s3, 4  ;;  %s539_s1 = int_to_ptr.vmem [resolvable:$true] %s538_s1 }
  0x66   : > { %s2823_s23 = scalar_lea.vmem %s539_s1, 256  ;;  %p2831_p8 = scmp.lt.s32.totalorder %s539_s1, %s539_s1 }
  0x67   : > { %p2824_p4 = scmp.ne.s32.totalorder %s539_s1, %s2823_s23  ;;  %p2832_p7 = scmp.lt.s32.totalorder %s2823_s23, %s2823_s23 }
  0x69   : > { %p2826_p6 = pnand %p2824_p4, %p3219_p1  ;;  %p2833_p9 = por %p2832_p7, %p2831_p8 }
  0x6a   : > { %2507 = dma.hbm_to_vmem [thread:$0]  (!%p3213_p0), %s3660_s4, 16, %s515_s25, [#allocation10]  }
  0x6b   : > { %p2827_p5 = pneg %p2826_p6 }
  0x6d   : > { %p2834_p3 = pnand %p2833_p9, %p2827_p5 }
  0x6f   : > { %2837 = shalt.err (!%p2834_p3)
}
  0x70   : > { %s3018_s16 = smov 64   ;;  %s3019_s29 = smov 4  }
  0x71   : > { %2513 = dma.hbm_to_vmem [thread:$0]  (!%p3213_p0), %s3610_s7, 256, %s539_s1, [#allocation13], %s3018_s16, %s3018_s16, %s3019_s29  }
  0x72   : > { %s3020_s18 = smov [#allocation17]  }
  0x73   : > { %s574_s5 = sshll.u32 %s3020_s18, 4  ;;  %s575_s5 = int_to_ptr.vmem [resolvable:$true] %s574_s5 }
  0x74   : > { %s2849_s24 = scalar_lea.vmem %s575_s5, 256  ;;  %p2857_p13 = scmp.lt.s32.totalorder %s575_s5, %s575_s5 }
  0x75   : > { %p2850_p10 = scmp.ne.s32.totalorder %s575_s5, %s2849_s24  ;;  %p2858_p2 = scmp.lt.s32.totalorder %s2849_s24, %s2849_s24 }
  0x77   : > { %p2852_p12 = pnand %p2850_p10, %p3219_p1  ;;  %p2859_p4 = por %p2858_p2, %p2857_p13 }
  0x79   : > { %p2853_p11 = pneg %p2852_p12 }
  0x7b   : > { %p2860_p6 = pnand %p2859_p4, %p2853_p11 }
  0x7d   : > { %2863 = shalt.err (!%p2860_p6)
}
  0x7e   : > { %2519 = dma.hbm_to_vmem [thread:$0]  (!%p3213_p0), %s3616_s13, 256, %s575_s5, [#allocation16], %s3018_s16, %s3018_s16, %s3019_s29  }
  0x7f   : > { %p3661_p5 = scmp.ne.s32.totalorder %s3652_s2, 0 }
  0x80   : > { %p3662_p8 = scmp.ne.s32.totalorder (!%p3661_p5), %s3653_s19, 0 }
  0x81   : > { %615 = sbr.rel (%p3661_p5) target bundleno = 2448 (0x990), region = 88 }
  0x86   : > { %2953 = dma.done.wait (%p3662_p8), [#allocation7], 16  }
  0x87   : > { %2955 = vsyncadd (%p3662_p8), [#allocation7], 4294967280 }
  0x88   : > { %2957 = dma.done.wait (%p3662_p8), [#allocation10], 32  }
  0x89   : > { %2959 = vsyncadd (%p3662_p8), [#allocation10], 4294967264 }
  0x8a   : > { %2961 = dma.done.wait (%p3662_p8), [#allocation13], 272  }
  0x8b   : > { %2963 = vsyncadd (%p3662_p8), [#allocation13], 4294967024 }
  0x8c   : > { %2965 = dma.done.wait (%p3662_p8), [#allocation16], 272  }
  0x8d   : > { %2967 = vsyncadd (%p3662_p8), [#allocation16], 4294967024  ;;  %s3291_s17 = sand.u32 1, %s2982_s28   ;;  %p703_p0 = scmp.lt.s32.totalorder %s2994_s0, 1 }
  0x8e   : > { %s2212_s2 = sshll.u32 %s3291_s17, 3  ;;  %s3663_s22 = sld [smem:[#allocation34_spill]] }
  0x8f   : > { %s704_s21 = scalar_select %p703_p0, %s2994_s0, 1 }
  0x90   : > { %s3664_s24 = sld [smem:[#allocation35_spill]]  ;;  %s3306_s3 = scalar_lea.vmem [#allocation18], %s2212_s2 }
  0x91   : > { %s2292_s1 = sshll.u32 %s704_s21, 3  ;;  %s3308_s23 = scalar_lea.vmem [#allocation19], %s2212_s2 }
  0x92   : > { %p2218_p1 = scmp.ne.s32.totalorder %s2990_s30, 0 }
  0x93   : > { %s3311_s4 = smov (!%p2218_p1), 0  }
  0x94   : > { %s3299_s25 = scalar_lea.vmem %s3663_s22, %s2292_s1  ;;  %717 = sbr.rel (%p2218_p1) target bundleno = 690 (0x2b2), region = 120 }
  0x96   : > { %s3304_s19 = scalar_lea.vmem %s3664_s24, %s2292_s1 }
  0x99 LB: >> { %s2219_s21 = sshll.u32 %s3010_s4, 3  ;;  %vm735_vm0 = vcmask 261120   ;;  %v2637_v6 = vld [vmem:[#allocation14 + $0x8] sm:$0xff]   ;;  %s3021_s22 = smov 96   ;;  %v2642_v8 = vld [vmem:[#allocation14] sm:$0xff]   ;;  %v3023_v22 = vmov 0.0   ;;  %s3010_s4 = sphi %s3311_s4, %s723_s4  }
  0x9a   : >> { %s725_s1 = sshra.s32 %s2219_s21, 3  ;;  %v2640_v7 = vld [vmem:[#allocation14 + $0x8] sm:$0xff]   ;;  %s3022_s18 = smov 64   ;;  %2350 = vmatprep.subr.bf16.mxu1 %v3023_v22  ;;  %2342 = vmatprep.subr.bf16.mxu0 %v3023_v22  ;;  %v2645_v23 = vld [vmem:[%s3609_s6] sm:$0xff]   ;;  %vm3024_vm1 = vmmov 0   ;;  %vm927_vm2 = vcmask 257024  }
  0x9b   : >> { %s3317_s16 = sshll.u32 %s725_s1, 2  ;;  %v2635_v19 = vld [vmem:[%s3609_s6 + $0x8] sm:$0xff]   ;;  %2354 = vmatprep.mubr.msk.bf16.mxu1 %vm3024_vm1, %v3023_v22  ;;  %2346 = vmatprep.mubr.msk.bf16.mxu0 %vm3024_vm1, %v3023_v22  ;;  %v2638_v26 = vld [vmem:[%s3609_s6] sm:$0xff]   ;;  %v3363_v29 = vld [vmem:[#allocation15] ss:$0 sm:$0xff]  ;;  %s723_s4 = sadd.s32 1, %s3010_s4  }
  0x9c   : >> { %s728_s2 = scalar_lea.vmem %s3299_s25, %s3317_s16  ;;  %s732_s29 = scalar_lea.vmem %s3304_s19, %s3317_s16  ;;  %v2643_v20 = vld [vmem:[%s3609_s6 + $0x8] sm:$0xff]   ;;  %v2641_v28 = vld [vmem:[%s3609_s6] sm:$0xff]   ;;  %v2222_v38 = vld [vmem:[#allocation6] ss:$0 sm:$0xff] }
  0x9d   : >> { %v729_v0 = vld [vmem:[%s728_s2] sm:$0xf]  ;;  %v2644_v21 = vld [vmem:[#allocation14 + $0x8] sm:$0xff]   ;;  %2351 = vmatpush3.bf16.msra.mxu1 %v2643_v20  ;;  %v2646_v24 = vld [vmem:[#allocation14] sm:$0xff]   ;;  %s1195_s5 = scalar_lea.vmem [#allocation4], %s3317_s16  ;;  %p720_p7 = scmp.ge.s32.totalorder %s723_s4, 2  }
  0x9e   : >> { %v733_v1 = vld [vmem:[%s732_s29] sm:$0xf]  ;;  %v730_v2 = vunpack.c.l.bf16 %v729_v0  ;;  %2343 = vmatpush3.bf16.msra.mxu0 %v2644_v21  ;;  %v2636_v25 = vld [vmem:[#allocation14] sm:$0xff]   ;;  %2352 = vmatprep.subr.bf16.mxu1 %v3023_v22  ;;  %v2223_v41 = vld [vmem:[#allocation9] ss:$0 sm:$0xff] }
  0x9f   : >> { %v734_v3 = vunpack.c.l.bf16 %v733_v1  ;;  %2344 = vmatprep.subr.bf16.mxu0 %v3023_v22  ;;  %v2639_v27 = vld [vmem:[%s3609_s6 + $0x8] sm:$0xff]   ;;  %v2224_v44 = vld [vmem:[#allocation11] ss:$0 sm:$0xff]  ;;  %v2225_v47 = vld [vmem:[#allocation12] ss:$0 sm:$0xff] }
  0xa0   : >> { %v736_v4 = vsel %vm735_vm0, %v730_v2, 0.0 }
  0xa1   : >> { %737 = vadd.xlane.f32.xlu0 %v736_v4  ;;  %v767_v5 = vsel %vm735_vm0, %v734_v3, 0.0  ;;  %2353 = vmatpush3.bf16.msra.mxu1 %v2645_v23 }
  0xa2   : >> { %2345 = vmatpush3.bf16.msra.mxu0 %v2646_v24  ;;  %2366 = vmatprep.subr.bf16.mxu1 %v3023_v22 }
  0xa3   : >> { %2358 = vmatprep.subr.bf16.mxu0 %v3023_v22 }
  0xa5   : >> { %768 = vadd.xlane.f32.xlu0 %v767_v5 }
  0xbb   : >> { %949 = vrot.lane.b32.xlu0 %v2637_v6, %s3021_s22 }
  0xbf   : >> { %1083 = vrot.lane.b32.xlu0 %v2640_v7, %s3022_s18 }
  0xc3   : >> { %1081 = vrot.lane.b32.xlu0 %v2642_v8, %s3022_s18 }
  0xc7   : >> { %1055 = vrot.lane.b32.xlu0 %v3363_v29, %s3021_s22 }
 0x12a   : >> { %v738_v9 = vpop.xlane.xlu0 %737 }
 0x12b   : >> { %v740_v10 = vmul.f32 0.03125, %v738_v9 }
 0x12d   : >> { %v741_v11 = vsub.f32 %v730_v2, %v740_v10 }
 0x12e   : >> { %v769_v12 = vpop.xlane.xlu0 %768 }
 0x12f   : >> { %v770_v13 = vmul.f32 0.03125, %v769_v12  ;;  %v742_v14 = vmul.f32 %v741_v11, %v741_v11 }
 0x131   : >> { %v771_v15 = vsub.f32 %v734_v3, %v770_v13  ;;  %v743_v16 = vsel %vm735_vm0, %v742_v14, 0.0 }
 0x132   : >> { %744 = vadd.xlane.f32.xlu1 %v743_v16  ;;  %v950_v52 = vpop.permute.xlu0 %949 }
 0x133   : >> { %v772_v17 = vmul.f32 %v771_v15, %v771_v15 }
 0x135   : >> { %v773_v18 = vsel %vm735_vm0, %v772_v17, 0.0 }
 0x136   : >> { %774 = vadd.xlane.f32.xlu1 %v773_v18  ;;  %v1084_v55 = vpop.permute.xlu0 %1083 }
 0x13a   : >> { %v1082_v57 = vpop.permute.xlu0 %1081 }
 0x13e   : >> { %v1056_v8 = vpop.permute.xlu0 %1055 }
 0x147   : >> { %1005 = vrot.lane.b32.xlu1 %v2635_v19, %s3021_s22 }
 0x14b   : >> { %947 = vrot.lane.b32.xlu1 %v2636_v25, %s3021_s22 }
 0x14f   : >> { %1003 = vrot.lane.b32.xlu1 %v2638_v26, %s3021_s22  ;;  %s926_s22 = scalar_lea.vmem [#allocation2], %s3317_s16 }
 0x153   : >> { %1139 = vrot.lane.b32.xlu1 %v2639_v27, %s3022_s18 }
 0x157   : >> { %1137 = vrot.lane.b32.xlu1 %v2641_v28, %s3022_s18 }
 0x15b   : >> { %1189 = vrot.lane.b32.xlu1 %v3363_v29, %s3022_s18  ;;  %s1061_s18 = scalar_lea.vmem [#allocation3], %s3317_s16 }
 0x1bb   : >> { %v745_v30 = vpop.xlane.xlu1 %744 }
 0x1bc   : >> { %v746_v31 = vmul.f32 0.03125, %v745_v30 }
 0x1be   : >> { %v747_v32 = vadd.f32 1e-05, %v746_v31 }
 0x1bf   : >> { %v775_v33 = vpop.xlane.xlu1 %774 }
 0x1c0   : >> { %2647 = vrsqrt.f32 %v747_v32  ;;  %v776_v34 = vmul.f32 0.03125, %v775_v33 }
 0x1c2   : >> { %v777_v35 = vadd.f32 1e-05, %v776_v34 }
 0x1c3   : >> { %v1006_v36 = vpop.permute.xlu1 %1005 }
 0x1c4   : >> { %2649 = vrsqrt.f32 %v777_v35 }
 0x1c7   : >> { %v948_v40 = vpop.permute.xlu1 %947 }
 0x1cb   : >> { %v1004_v50 = vpop.permute.xlu1 %1003 }
 0x1cd   : >> { %v2648_v37 = vpop.eup %2647 }
 0x1ce   : >> { %v749_v39 = vmul.f32 %v2648_v37, %v741_v11 }
 0x1cf   : >> { %v1140_v54 = vpop.permute.xlu1 %1139 }
 0x1d0   : >> { %v757_v42 = vmul.f32 %v2222_v38, %v749_v39 }
 0x1d1   : >> { %v2650_v43 = vpop.eup %2649 }
 0x1d2   : >> { %v765_v45 = vadd.f32 %v2223_v41, %v757_v42  ;;  %v779_v46 = vmul.f32 %v2650_v43, %v771_v15 }
 0x1d3   : >> { %v1138_v56 = vpop.permute.xlu1 %1137 }
 0x1d4   : >> { %v766_v48 = vpack.c.bf16 %v765_v45, %v765_v45  ;;  %v787_v49 = vmul.f32 %v2224_v44, %v779_v46 }
 0x1d6   : >> { %2355 = vmatmul.mubr.msk.bf16.vlgmr.msra.gmra.mxu1 %vm735_vm0, %v766_v48  ;;  %v795_v51 = vadd.f32 %v2225_v47, %v787_v49 }
 0x1d7   : >> { %2367 = vmatpush3.bf16.msra.mxu1 %v1006_v36  ;;  %2370 = vmatprep.mubr.msk.bf16.mxu1 %vm3024_vm1, %v3023_v22  ;;  %v1190_v20 = vpop.permute.xlu1 %1189 }
 0x1d8   : >> { %v796_v53 = vpack.c.bf16 %v795_v51, %v795_v51  ;;  %2368 = vmatprep.subr.bf16.mxu1 %v3023_v22 }
 0x1da   : >> { %2347 = vmatmul.mubr.msk.bf16.vlgmr.msra.gmra.mxu0 %vm735_vm0, %v796_v53 }
 0x1db   : >> { %2359 = vmatpush3.bf16.msra.mxu0 %v950_v52  ;;  %2369 = vmatpush3.bf16.msra.mxu1 %v1004_v50 }
 0x1dc   : >> { %2360 = vmatprep.subr.bf16.mxu0 %v3023_v22  ;;  %2382 = vmatprep.subr.bf16.mxu1 %v3023_v22 }
 0x1dd   : >> { %2362 = vmatprep.mubr.msk.bf16.mxu0 %vm3024_vm1, %v3023_v22 }
 0x1de   : >> { %2371 = vmatmul.mubr.msk.bf16.vlgmr.msra.gmra.mxu1 %vm735_vm0, %v766_v48 }
 0x1df   : >> { %2361 = vmatpush3.bf16.msra.mxu0 %v948_v40  ;;  %2383 = vmatpush3.bf16.msra.mxu1 %v1140_v54 }
 0x1e0   : >> { %2374 = vmatprep.subr.bf16.mxu0 %v3023_v22  ;;  %2384 = vmatprep.subr.bf16.mxu1 %v3023_v22 }
 0x1e1   : >> { %2386 = vmatprep.mubr.msk.bf16.mxu1 %vm3024_vm1, %v3023_v22 }
 0x1e2   : >> { %2363 = vmatmul.mubr.msk.bf16.vlgmr.msra.gmra.mxu0 %vm735_vm0, %v796_v53 }
 0x1e3   : >> { %2375 = vmatpush3.bf16.msra.mxu0 %v1084_v55  ;;  %2385 = vmatpush3.bf16.msra.mxu1 %v1138_v56 }
 0x1e4   : >> { %2376 = vmatprep.subr.bf16.mxu0 %v3023_v22  ;;  %2378 = vmatprep.mubr.msk.bf16.mxu0 %vm3024_vm1, %v3023_v22 }
 0x1e6   : >> { %2387 = vmatmul.mubr.msk.bf16.vlgmr.msra.gmra.mxu1 %vm735_vm0, %v766_v48 }
 0x1e7   : >> { %2377 = vmatpush3.bf16.msra.mxu0 %v1082_v57 }
 0x1ea   : >> { %2379 = vmatmul.mubr.msk.bf16.vlgmr.msra.gmra.mxu0 %vm735_vm0, %v796_v53 }
 0x296   : >> { %v909_v58 = vpop.f32.mrf.mxu1 }
 0x298   : >> { %v2356_v59 = vpop.f32.mrf.mxu1 }
 0x29a   : >> { %v854_v60 = vpop.f32.mrf.mxu0  ;;  %v912_v61 = vpop.f32.mrf.mxu1 }
 0x29b   : >> { %v910_v62 = vadd.f32 %v909_v58, %v854_v60 }
 0x29c   : >> { %v2348_v63 = vpop.f32.mrf.mxu0  ;;  %v2357_v0 = vpop.f32.mrf.mxu1 }
 0x29d   : >> { %v922_v1 = vadd.f32 %v3363_v29, %v910_v62 }
 0x29e   : >> { %v857_v2 = vpop.f32.mrf.mxu0  ;;  %v1043_v3 = vpop.f32.mrf.mxu1 }
 0x29f   : >> { %v923_v4 = vmul.f32 0.35355338, %v922_v1 }
 0x2a0   : >> { %v2349_v5 = vpop.f32.mrf.mxu0  ;;  %v2372_v6 = vpop.f32.mrf.mxu1 }
 0x2a1   : >> { %v924_v7 = vpack.c.bf16 %v923_v4, %v923_v4 }
 0x2a2   : >> { %v987_v9 = vpop.f32.mrf.mxu0  ;;  %v1046_v10 = vpop.f32.mrf.mxu1 }
 0x2a3   : >> { %v1044_v11 = vadd.f32 %v1043_v3, %v987_v9  ;;  %928 = vst.msk [vmem:[%s926_s22] sm:$0xf] %vm927_vm2, %v924_v7 }
 0x2a4   : >> { %v2364_v12 = vpop.f32.mrf.mxu0  ;;  %v2373_v13 = vpop.f32.mrf.mxu1 }
 0x2a5   : >> { %v1058_v14 = vadd.f32 %v1056_v8, %v1044_v11 }
 0x2a6   : >> { %v990_v15 = vpop.f32.mrf.mxu0  ;;  %v1177_v16 = vpop.f32.mrf.mxu1 }
 0x2a7   : >> { %v1059_v17 = vpack.c.bf16 %v1058_v14, %v1058_v14 }
 0x2a8   : >> { %v2365_v18 = vpop.f32.mrf.mxu0  ;;  %v2388_v19 = vpop.f32.mrf.mxu1 }
 0x2a9   : >> { %1062 = vst.msk [vmem:[%s1061_s18] sm:$0xf] %vm927_vm2, %v1059_v17 }
 0x2aa   : >> { %v1121_v21 = vpop.f32.mrf.mxu0  ;;  %v1180_v22 = vpop.f32.mrf.mxu1 }
 0x2ab   : >> { %v1178_v23 = vadd.f32 %v1177_v16, %v1121_v21 }
 0x2ac   : >> { %v2389_v24 = vpop.f32.mrf.mxu1  ;;  %v2380_v25 = vpop.f32.mrf.mxu0 }
 0x2ad   : >> { %v1192_v26 = vadd.f32 %v1190_v20, %v1178_v23  ;;  %722 = sbr.rel (!%p720_p7) target bundleno = 153 (0x99), region = 191 }
 0x2ae   : >> { %v1124_v27 = vpop.f32.mrf.mxu0 }
 0x2af   : >> { %v1193_v28 = vpack.c.bf16 %v1192_v26, %v1192_v26 }
 0x2b0   : >> { %v2381_v29 = vpop.f32.mrf.mxu0 }
 0x2b1   : >> { %1196 = vst.msk [vmem:[%s1195_s5] sm:$0xf] %vm927_vm2, %v1193_v28 }
 0x2b2 PF: > { %v2651_v30 = vld [vmem:[#allocation3] sm:$0xff]   ;;  %v3025_v31 = vmov 0.0   ;;  %vm1212_vm3 = vcmask 64512   ;;  %s3026_s24 = smov 120   ;;  %vm3027_vm4 = vmmov 0   ;;  %s2250_s4 = sshll.u32 %s2990_s30, 3 }
 0x2b3   : > { %2390 = vmatprep.subr.bf16.mxu0 %v3025_v31  ;;  %2402 = vmatprep.subr.bf16.mxu1 %v3025_v31  ;;  %v1217_v32 = vsel %vm1212_vm3, %v2651_v30, 0  ;;  %s3028_s16 = smov 112   ;;  %s1198_s21 = sshra.s32 %s2250_s4, 3  ;;  %vm1259_vm5 = vcmask 130048   ;;  %vm1322_vm6 = vcmask 60416   ;;  %vm1442_vm7 = vcmask 126016  }
 0x2b4   : > { %1329 = vrot.lane.b32.xlu0 %v2651_v30, %s3026_s24  ;;  %2392 = vmatprep.mubr.msk.bf16.mxu0 %vm3027_vm4, %v3025_v31  ;;  %s3407_s1 = sshll.u32 %s1198_s21, 2  ;;  %s3029_s29 = smov 104   ;;  %vm1559_vm8 = vcmask 191616   ;;  %vm1676_vm9 = vcmask 257216   ;;  %vm1702_vm10 = vcmask 261120   ;;  %vm1901_vm11 = vcmask 523264  }
 0x2b5   : > { %2391 = vmatpush3.bf16.xpose.msra.mxu0 %v1217_v32  ;;  %1446 = vrot.lane.b32.xlu1 %v2651_v30, %s3028_s16  ;;  %s1201_s2 = scalar_lea.vmem [#allocation2], %s3407_s1  ;;  %s3030_s22 = smov 8  }
 0x2b6   : > { %2404 = vmatprep.mubr.msk.bf16.mxu1 %vm3027_vm4, %v3025_v31  ;;  %2396 = vmatprep.subr.bf16.mxu0 %v3025_v31  ;;  %v1202_v33 = vld [vmem:[%s1201_s2] sm:$0xf]  ;;  %s3032_s21 = smov 24   ;;  %s1747_s2 = scalar_lea.vmem %s3299_s25, %s3407_s1 }
 0x2b7   : > { %v2256_v34 = vcombine.low %v1202_v33, %v1202_v33  ;;  %p3666_p3 = scmp.ne.s32.totalorder %s3648_s26, 0  ;;  %s3033_s25 = smov [#allocation19]  }
 0x2b8   : > { %v2653_v49 = vld [vmem:[#allocation4] sm:$0xff]  }
 0x2b9   : > { %1327 = vrot.lane.b32.xlu0 %v2256_v34, %s3026_s24  ;;  %1444 = vrot.lane.b32.xlu1 %v2256_v34, %s3028_s16 }
 0x2bc   : > { %2393 = vmatmul.mubr.msk.bf16.vlgmr.msra.gmra.mxu0 %vm1212_vm3, %v1202_v33 }
 0x2bd   : > { %2398 = vmatprep.mubr.msk.bf16.mxu0 %vm3027_vm4, %v3025_v31  ;;  %1563 = vrot.lane.b32.xlu0 %v2651_v30, %s3029_s29 }
 0x2be   : > { %1561 = vrot.lane.b32.xlu1 %v2256_v34, %s3029_s29  ;;  %2397 = vmatpush3.bf16.msra.mxu0 %v2653_v49 }
 0x2bf   : > { %2408 = vmatprep.subr.bf16.mxu0 %v3025_v31 }
 0x326   : > { %v1330_v35 = vpop.permute.xlu0 %1329 }
 0x327   : > { %v1335_v36 = vsel %vm1212_vm3, %v1330_v35, 0  ;;  %v1447_v37 = vpop.permute.xlu1 %1446 }
 0x328   : > { %2403 = vmatpush3.bf16.xpose.msra.mxu1 %v1335_v36  ;;  %v1452_v38 = vsel %vm1212_vm3, %v1447_v37, 0 }
 0x329   : > { %2414 = vmatprep.subr.bf16.mxu1 %v3025_v31 }
 0x32b   : > { %v1328_v39 = vpop.permute.xlu0 %1327  ;;  %v1445_v41 = vpop.permute.xlu1 %1444 }
 0x32f   : > { %2405 = vmatmul.mubr.msk.bf16.vlgmr.msra.gmra.mxu1 %vm1212_vm3, %v1328_v39  ;;  %v1564_v40 = vpop.permute.xlu0 %1563 }
 0x330   : > { %2415 = vmatpush3.bf16.xpose.msra.mxu1 %v1452_v38  ;;  %2416 = vmatprep.mubr.msk.bf16.mxu1 %vm3027_vm4, %v3025_v31  ;;  %v1569_v42 = vsel %vm1212_vm3, %v1564_v40, 0  ;;  %v1562_v43 = vpop.permute.xlu1 %1561 }
 0x331   : > { %2426 = vmatprep.subr.bf16.mxu1 %v3025_v31 }
 0x337   : > { %2417 = vmatmul.mubr.msk.bf16.vlgmr.msra.gmra.mxu1 %vm1212_vm3, %v1445_v41 }
 0x338   : > { %2427 = vmatpush3.bf16.xpose.msra.mxu1 %v1569_v42  ;;  %2428 = vmatprep.mubr.msk.bf16.mxu1 %vm3027_vm4, %v3025_v31 }
 0x339   : > { %2438 = vmatprep.subr.bf16.mxu1 %v3025_v31 }
 0x33f   : > { %2429 = vmatmul.mubr.msk.bf16.vlgmr.msra.gmra.mxu1 %vm1212_vm3, %v1562_v43 }
 0x340   : > { %2442 = vmatprep.mubr.msk.bf16.mxu1 %vm3027_vm4, %v3025_v31 }
 0x37c   : > { %v1253_v44 = vpop.f32.mrf.mxu0 }
 0x37d   : > { %v1260_v45 = vsel %vm1259_vm5, %v1253_v44, -inf }
 0x37e   : > { %1261 = vmax.xlane.f32.xlu0 %v1260_v45  ;;  %v2394_v46 = vpop.f32.mrf.mxu0 }
 0x380   : > { %v1256_v47 = vpop.f32.mrf.mxu0 }
 0x381   : > { %v2654_v47 = vld [vmem:[%s3612_s9 + $0x8] sm:$0xff]  }
 0x382   : > { %v2395_v48 = vpop.f32.mrf.mxu0  ;;  %2439 = vmatpush3.bf16.msra.mxu1 %v2654_v47 }
 0x383   : > { %2440 = vmatprep.subr.bf16.mxu1 %v3025_v31 }
 0x3ef   : > { %v1371_v50 = vpop.f32.mrf.mxu1 }
 0x3f0   : > { %v1377_v51 = vsel %vm1259_vm5, %v1371_v50, -inf }
 0x3f1   : > { %1378 = vmax.xlane.f32.xlu1 %v1377_v51  ;;  %v2406_v52 = vpop.f32.mrf.mxu1  ;;  %v2655_v51 = vld [vmem:[%s3612_s9] sm:$0xff]  }
 0x3f2   : > { %2441 = vmatpush3.bf16.msra.mxu1 %v2655_v51 }
 0x3f3   : > { %v1374_v53 = vpop.f32.mrf.mxu1  ;;  %2454 = vmatprep.subr.bf16.mxu1 %v3025_v31 }
 0x3f5   : > { %v2407_v54 = vpop.f32.mrf.mxu1 }
 0x3f7   : > { %v1488_v55 = vpop.f32.mrf.mxu1 }
 0x3f8   : > { %v1494_v56 = vsel %vm1259_vm5, %v1488_v55, -inf }
 0x3f9   : > { %v2418_v57 = vpop.f32.mrf.mxu1  ;;  %1495 = vmax.xlane.f32.xlu0 %v1494_v56 }
 0x3fb   : > { %v1491_v58 = vpop.f32.mrf.mxu1 }
 0x3fd   : > { %v2419_v59 = vpop.f32.mrf.mxu1 }
 0x3ff   : > { %v1605_v60 = vpop.f32.mrf.mxu1 }
 0x400   : > { %v1611_v61 = vsel %vm1259_vm5, %v1605_v60, -inf }
 0x401   : > { %v2430_v62 = vpop.f32.mrf.mxu1  ;;  %1612 = vmax.xlane.f32.xlu0 %v1611_v61 }
 0x402   : > { %1387 = vrot.lane.b32.xlu1 %v2653_v49, %s3026_s24 }
 0x403   : > { %v1608_v63 = vpop.f32.mrf.mxu1 }
 0x405   : > { %v2431_v0 = vpop.f32.mrf.mxu1 }
 0x406   : > { %1621 = vrot.lane.b32.xlu1 %v2653_v49, %s3029_s29  ;;  %s1751_s29 = scalar_lea.vmem %s3304_s19, %s3407_s1  ;;  %s2286_s1 = sshll.u32 %s2994_s0, 1 }
 0x407   : > { %v1262_v1 = vpop.xlane.xlu0 %1261  ;;  %s3516_s5 = sadd.s32 %s2990_s30, %s2286_s1  ;;  %s2868_s0 = sshll.u32 %s3033_s25, 4  ;;  %s2869_s0 = int_to_ptr.vmem [resolvable:$false] %s2868_s0 }
 0x408   : > { %v1263_v2 = vsub.f32 %v1253_v44, %v1262_v1  ;;  %s3634_s24 = sshll.u32 %s3516_s5, 7  ;;  %s2870_s30 = scalar_lea.vmem %s2869_s0, 256 }
 0x40a   : > { %v1264_v3 = vmul.f32 1.442695, %v1263_v2 }
 0x40c   : > { %2662 = vpow2.f32 %v1264_v3  ;;  %v1748_v3 = vld [vmem:[%s1747_s2] sm:$0xf] }
 0x417   : > { %1504 = vrot.lane.b32.xlu0 %v2653_v49, %s3028_s16  ;;  %s3031_s16 = smov 16  }
 0x419   : > { %v2663_v4 = vpop.eup %2662 }
 0x41a   : > { %v1269_v5 = vpack.c.bf16 %v2663_v4, %v2663_v4  ;;  %v1266_v20 = vsel %vm1259_vm5, %v2663_v4, 0.0  ;;  %v1752_v4 = vld [vmem:[%s1751_s29] sm:$0xf]  ;;  %s1985_s29 = sshll.u32 %s3308_s23, 4  ;;  %s1986_s29 = int_to_ptr.vmem [resolvable:$true] %s1985_s29 }
 0x41b   : > { %s2864_s18 = scalar_lea.vmem %s1986_s29, 128  ;;  %p2871_p11 = scmp.lt.s32.totalorder %s1986_s29, %s2869_s0 }
 0x41c   : > { %2399 = vmatmul.mubr.msk.bf16.vlgmr.msra.gmra.mxu0 %vm1259_vm5, %v1269_v5  ;;  %v2266_v5 = vld [vmem:[%s3613_s10] ss:$0 sm:$0xff]  ;;  %p2865_p9 = scmp.ne.s32.totalorder %s1986_s29, %s2864_s18  ;;  %p2872_p13 = scmp.lt.s32.totalorder %s2870_s30, %s2864_s18 }
 0x41d   : > { %2410 = vmatprep.mubr.msk.bf16.mxu0 %vm3027_vm4, %v3025_v31 }
 0x41e   : > { %p2866_p10 = pnand %p2865_p9, %p3666_p3  ;;  %p2873_p2 = por %p2872_p13, %p2871_p11 }
 0x420   : > { %p2867_p12 = pneg %p2866_p10 }
 0x422   : > { %p2874_p4 = pnand %p2873_p2, %p2867_p12 }
 0x47a   : > { %v1379_v6 = vpop.xlane.xlu1 %1378 }
 0x47b   : > { %v1380_v7 = vsub.f32 %v1371_v50, %v1379_v6  ;;  %v1749_v6 = vunpack.c.l.bf16 %v1748_v3 }
 0x47d   : > { %v1381_v8 = vmul.f32 1.442695, %v1380_v7  ;;  %v1753_v7 = vunpack.c.l.bf16 %v1752_v4 }
 0x47e   : > { %v1388_v9 = vpop.permute.xlu1 %1387 }
 0x47f   : > { %2664 = vpow2.f32 %v1381_v8  ;;  %2409 = vmatpush3.bf16.msra.mxu0 %v1388_v9 }
 0x480   : > { %2420 = vmatprep.subr.bf16.mxu0 %v3025_v31 }
 0x482   : > { %v1496_v10 = vpop.xlane.xlu0 %1495  ;;  %v1622_v23 = vpop.permute.xlu1 %1621 }
 0x483   : > { %v1497_v11 = vsub.f32 %v1488_v55, %v1496_v10 }
 0x485   : > { %v1498_v12 = vmul.f32 1.442695, %v1497_v11 }
 0x487   : > { %2666 = vpow2.f32 %v1498_v12 }
 0x48a   : > { %v1613_v13 = vpop.xlane.xlu0 %1612 }
 0x48b   : > { %v1614_v14 = vsub.f32 %v1605_v60, %v1613_v13 }
 0x48c   : > { %v2665_v15 = vpop.eup %2664 }
 0x48d   : > { %v1615_v16 = vmul.f32 1.442695, %v1614_v14  ;;  %v1383_v17 = vsel %vm1259_vm5, %v2665_v15, 0.0  ;;  %v1386_v18 = vpack.c.bf16 %v2665_v15, %v2665_v15 }
 0x48e   : > { %1384 = vadd.xlane.f32.xlu1 %v1383_v17  ;;  %v1505_v19 = vpop.permute.xlu0 %1504 }
 0x48f   : > { %2668 = vpow2.f32 %v1615_v16  ;;  %2411 = vmatmul.mubr.msk.bf16.vlgmr.msra.gmra.mxu0 %vm1259_vm5, %v1386_v18 }
 0x490   : > { %2421 = vmatpush3.bf16.msra.mxu0 %v1505_v19  ;;  %2422 = vmatprep.mubr.msk.bf16.mxu0 %vm3027_vm4, %v3025_v31 }
 0x491   : > { %2432 = vmatprep.subr.bf16.mxu0 %v3025_v31 }
 0x492   : > { %1267 = vadd.xlane.f32.xlu1 %v1266_v20 }
 0x494   : > { %v2667_v21 = vpop.eup %2666 }
 0x495   : > { %v1500_v22 = vsel %vm1259_vm5, %v2667_v21, 0.0  ;;  %v1503_v24 = vpack.c.bf16 %v2667_v21, %v2667_v21  ;;  %v2656_v21 = vld [vmem:[#allocation17 + $0x8] sm:$0xff]  }
 0x496   : > { %1501 = vadd.xlane.f32.xlu0 %v1500_v22  ;;  %v2657_v22 = vld [vmem:[#allocation17] sm:$0xff]  }
 0x497   : > { %2423 = vmatmul.mubr.msk.bf16.vlgmr.msra.gmra.mxu0 %vm1259_vm5, %v1503_v24 }
 0x498   : > { %2433 = vmatpush3.bf16.msra.mxu0 %v1622_v23  ;;  %2434 = vmatprep.mubr.msk.bf16.mxu0 %vm3027_vm4, %v3025_v31 }
 0x499   : > { %2446 = vmatprep.subr.bf16.mxu0 %v3025_v31 }
 0x49c   : > { %v2669_v25 = vpop.eup %2668 }
 0x49d   : > { %v1617_v26 = vsel %vm1259_vm5, %v2669_v25, 0.0  ;;  %v1620_v27 = vpack.c.bf16 %v2669_v25, %v2669_v25 }
 0x49e   : > { %1618 = vadd.xlane.f32.xlu0 %v1617_v26 }
 0x49f   : > { %2435 = vmatmul.mubr.msk.bf16.vlgmr.msra.gmra.mxu0 %vm1259_vm5, %v1620_v27  ;;  %v2272_v27 = vld [vmem:[%s3614_s11] ss:$0 sm:$0xff] }
 0x4a0   : > { %2450 = vmatprep.mubr.msk.bf16.mxu0 %vm3027_vm4, %v3025_v31  ;;  %2447 = vmatpush3.bf16.msra.mxu0 %v2656_v21 }
 0x4a1   : > { %2448 = vmatprep.subr.bf16.mxu0 %v3025_v31 }
 0x4a4   : > { %2449 = vmatpush3.bf16.msra.mxu0 %v2657_v22 }
 0x4dc   : > { %v1313_v28 = vpop.f32.mrf.mxu0 }
 0x4de   : > { %v2400_v29 = vpop.f32.mrf.mxu0 }
 0x4df   : > { %v2273_v29 = vld [vmem:[%s3615_s12] ss:$0 sm:$0xff] }
 0x4e0   : > { %v1316_v30 = vpop.f32.mrf.mxu0 }
 0x4e2   : > { %v2401_v32 = vpop.f32.mrf.mxu0 }
 0x517   : > { %v1385_v33 = vpop.xlane.xlu1 %1384 }
 0x51b   : > { %v1268_v34 = vpop.xlane.xlu1 %1267 }
 0x51c   : > { %2670 = vrcp.f32 %v1268_v34  ;;  %v2658_v34 = vld [vmem:[%s3618_s15 + $0x18] sm:$0xff]  }
 0x51d   : > { %2672 = vrcp.f32 %v1385_v33 }
 0x51f   : > { %v1502_v38 = vpop.xlane.xlu0 %1501 }
 0x520   : > { %2674 = vrcp.f32 %v1502_v38  ;;  %v2274_v38 = vld [vmem:[%s3617_s14] ss:$0 sm:$0xff] }
 0x527   : > { %v1619_v40 = vpop.xlane.xlu0 %1618 }
 0x528   : > { %2676 = vrcp.f32 %v1619_v40 }
 0x529   : > { %v2671_v35 = vpop.eup %2670 }
 0x52a   : > { %v1320_v36 = vmul.f32 %v2671_v35, %v1313_v28  ;;  %v2673_v39 = vpop.eup %2672  ;;  %v2659_v35 = vld [vmem:[%s3618_s15 + $0x10] sm:$0xff]  }
 0x52c   : > { %v1321_v37 = vpack.c.bf16 %v1320_v36, %v1320_v36  ;;  %v2660_v36 = vld [vmem:[%s3618_s15 + $0x8] sm:$0xff]  }
 0x52d   : > { %v2675_v48 = vpop.eup %2674 }
 0x52e   : > { %1323 = vst.msk [vmem:[#allocation5] sm:$0xf] %vm1322_vm6, %v1321_v37  ;;  %v2661_v37 = vld [vmem:[%s3618_s15] sm:$0xff]  }
 0x535   : > { %v2677_v56 = vpop.eup %2676 }
 0x54f   : > { %v1427_v41 = vpop.f32.mrf.mxu0 }
 0x550   : > { %v1434_v42 = vmul.f32 %v2673_v39, %v1427_v41 }
 0x551   : > { %v2412_v43 = vpop.f32.mrf.mxu0 }
 0x552   : > { %v2294_v44 = vpack.c.bf16 %v1434_v42, %v1434_v42 }
 0x553   : > { %v1430_v45 = vpop.f32.mrf.mxu0 }
 0x554   : > { %1439 = vrot.lane.b32.xlu0 %v2294_v44, %s3030_s22  ;;  %s1955_s22 = scalar_lea.sflag [#allocation20], %s3291_s17 }
 0x555   : > { %v2413_v46 = vpop.f32.mrf.mxu0 }
 0x557   : > { %v1544_v49 = vpop.f32.mrf.mxu0 }
 0x558   : > { %v1551_v50 = vmul.f32 %v2675_v48, %v1544_v49 }
 0x559   : > { %v2424_v52 = vpop.f32.mrf.mxu0 }
 0x55a   : > { %v2295_v53 = vpack.c.bf16 %v1551_v50, %v1551_v50 }
 0x55b   : > { %v1547_v54 = vpop.f32.mrf.mxu0 }
 0x55c   : > { %1556 = vrot.lane.b32.xlu1 %v2295_v53, %s3031_s16 }
 0x55d   : > { %v2425_v55 = vpop.f32.mrf.mxu0 }
 0x55f   : > { %v1661_v57 = vpop.f32.mrf.mxu0 }
 0x560   : > { %v1668_v58 = vmul.f32 %v2677_v56, %v1661_v57 }
 0x561   : > { %v2436_v59 = vpop.f32.mrf.mxu0 }
 0x562   : > { %v2296_v60 = vpack.c.bf16 %v1668_v58, %v1668_v58 }
 0x563   : > { %v1664_v61 = vpop.f32.mrf.mxu0 }
 0x564   : > { %1673 = vrot.lane.b32.xlu1 %v2296_v60, %s3032_s21  ;;  %s3665_s21 = sld [smem:[#allocation42_spill]] }
 0x565   : > { %v2437_v62 = vpop.f32.mrf.mxu0 }
 0x56a   : > { %s1983_s2 = scalar_lea.hbm %s3665_s21, %s3634_s24 }
 0x5c6   : > { %v1440_v63 = vpop.permute.xlu0 %1439 }
 0x5c7   : > { %1443 = vst.msk [vmem:[#allocation5] sm:$0xf] %vm1442_vm7, %v1440_v63 }
 0x5ce   : > { %v1557_v0 = vpop.permute.xlu1 %1556 }
 0x5cf   : > { %1560 = vst.msk [vmem:[#allocation5] sm:$0xf] %vm1559_vm8, %v1557_v0 }
 0x5d6   : > { %v1674_v1 = vpop.permute.xlu1 %1673 }
 0x5d7   : > { %1677 = vst.msk [vmem:[#allocation5] sm:$0xf] %vm1676_vm9, %v1674_v1 }
 0x5de   : > { %v1678_v2 = vld [vmem:[#allocation5] sm:$0xf] }
 0x5df   : > { %2443 = vmatmul.mubr.msk.bf16.vlgmr.msra.gmra.mxu1 %vm1702_vm10, %v1678_v2 }
 0x5e0   : > { %2462 = vmatprep.mubr.msk.bf16.mxu1 %vm3027_vm4, %v3025_v31  ;;  %2455 = vmatpush3.bf16.msra.mxu1 %v2658_v34 }
 0x5e1   : > { %2456 = vmatprep.subr.bf16.mxu1 %v3025_v31 }
 0x5e4   : > { %2457 = vmatpush3.bf16.msra.mxu1 %v2659_v35 }
 0x5e5   : > { %2458 = vmatprep.subr.bf16.mxu1 %v3025_v31 }
 0x5e8   : > { %2459 = vmatpush3.bf16.msra.mxu1 %v2660_v36 }
 0x5e9   : > { %2460 = vmatprep.subr.bf16.mxu1 %v3025_v31 }
 0x5ec   : > { %2461 = vmatpush3.bf16.msra.mxu1 %v2661_v37 }
 0x69f   : > { %v1740_v8 = vpop.f32.mrf.mxu1 }
 0x6a0   : > { %v1741_v9 = vadd.f32 %v2266_v5, %v1740_v8 }
 0x6a1   : > { %v2444_v10 = vpop.f32.mrf.mxu1 }
 0x6a2   : > { %v3480_v11 = vadd.f32 %v1749_v6, %v1741_v9  ;;  %v1947_v12 = vadd.f32 %v1753_v7, %v1741_v9 }
 0x6a3   : > { %v1743_v13 = vpop.f32.mrf.mxu1 }
 0x6a4   : > { %1948 = vst.msk [vmem:[%s3308_s23] sm:$0xff] %vm1702_vm10, %v1947_v12  ;;  %v1755_v14 = vsel %vm1702_vm10, %v3480_v11, 0.0 }
 0x6a5   : > { %1756 = vadd.xlane.f32.xlu0 %v1755_v14  ;;  %v2445_v15 = vpop.f32.mrf.mxu1 }
 0x72e   : > { %v1757_v16 = vpop.xlane.xlu0 %1756 }
 0x72f   : > { %v1759_v17 = vmul.f32 0.03125, %v1757_v16 }
 0x731   : > { %v1760_v18 = vsub.f32 %v3480_v11, %v1759_v17 }
 0x733   : > { %v1761_v19 = vmul.f32 %v1760_v18, %v1760_v18 }
 0x735   : > { %v1762_v20 = vsel %vm1702_vm10, %v1761_v19, 0.0 }
 0x736   : > { %1763 = vadd.xlane.f32.xlu1 %v1762_v20 }
 0x7bf   : > { %v1764_v23 = vpop.xlane.xlu1 %1763 }
 0x7c0   : > { %v1765_v24 = vmul.f32 0.03125, %v1764_v23 }
 0x7c2   : > { %v1766_v25 = vadd.f32 1e-05, %v1765_v24 }
 0x7c4   : > { %2678 = vrsqrt.f32 %v1766_v25 }
 0x7d1   : > { %v2679_v26 = vpop.eup %2678 }
 0x7d2   : > { %v1768_v28 = vmul.f32 %v2679_v26, %v1760_v18 }
 0x7d4   : > { %v1776_v30 = vmul.f32 %v2272_v27, %v1768_v28 }
 0x7d6   : > { %v1784_v32 = vadd.f32 %v2273_v29, %v1776_v30 }
 0x7d8   : > { %v1785_v33 = vpack.c.bf16 %v1784_v32, %v1784_v32 }
 0x7da   : > { %2451 = vmatmul.mubr.msk.bf16.vlgmr.msra.gmra.mxu0 %vm1702_vm10, %v1785_v33 }
 0x89a   : > { %v1846_v39 = vpop.f32.mrf.mxu0 }
 0x89b   : > { %v1847_v40 = vadd.f32 %v2274_v38, %v1846_v39 }
 0x89c   : > { %v2452_v41 = vpop.f32.mrf.mxu0 }
 0x89d   : > { %v1852_v42 = vmul.f32 %v1847_v40, %v1847_v40 }
 0x89e   : > { %v1849_v43 = vpop.f32.mrf.mxu0 }
 0x89f   : > { %v1853_v44 = vmul.f32 %v1852_v42, %v1847_v40 }
 0x8a0   : > { %v2453_v45 = vpop.f32.mrf.mxu0 }
 0x8a1   : > { %v1854_v31 = vmul.f32 0.044715, %v1853_v44 }
 0x8a3   : > { %v1855_v46 = vadd.f32 %v1854_v31, %v1847_v40 }
 0x8a5   : > { %v1856_v47 = vmul.f32 0.7978846, %v1855_v46 }
 0x8a7   : > { %2680 = vtanh.f32 %v1856_v47 }
 0x8b4   : > { %v2681_v48 = vpop.eup %2680 }
 0x8b5   : > { %v1858_v49 = vadd.f32 1.0, %v2681_v48 }
 0x8b7   : > { %v1859_v50 = vmul.f32 0.5, %v1858_v49 }
 0x8b9   : > { %v1860_v51 = vmul.f32 %v1859_v50, %v1847_v40 }
 0x8bb   : > { %v1861_v52 = vpack.c.bf16 %v1860_v51, %v1860_v51 }
 0x8bd   : > { %2463 = vmatmul.mubr.msk.bf16.vlgmr.msra.gmra.mxu1 %vm1901_vm11, %v1861_v52 }
 0x8be   : > { %2877 = shalt.err (!%p2874_p4)
}
 0x8bf   : > { %s2878_s19 = scalar_lea.hbm %s1983_s2, 128  ;;  %s2882_s4 = scalar_lea.hbm %s3665_s21, 512 }
 0x8c0   : > { %p2879_p6 = scmp.ne.s32.totalorder %s1983_s2, %s2878_s19  ;;  %p2883_p0 = scmp.lt.s32.totalorder %s1983_s2, %s3665_s21 }
 0x8c1   : > { %p2884_p1 = scmp.lt.s32.totalorder %s2882_s4, %s2878_s19 }
 0x8c2   : > { %p2880_p5 = pnand %p2879_p6, %p3666_p3 }
 0x8c3   : > { %p2885_p7 = por %p2884_p1, %p2883_p0 }
 0x8c4   : > { %p2881_p8 = pneg %p2880_p5 }
 0x8c6   : > { %p2886_p9 = pnand %p2885_p7, %p2881_p8 }
 0x8c8   : > { %2889 = shalt.err (!%p2886_p9)
}
 0x8c9   : > { %2495 = dma.vmem_to_hbm [thread:$0]  (%p3666_p3), %s1986_s29, 128, %s1983_s2, %s1955_s22  }
 0x8ca   : > { %s3667_s0 = sld [smem:[#allocation40_spill]]  ;;  %s1970_s30 = sshll.u32 %s3306_s3, 4  ;;  %s3550_s30 = int_to_ptr.vmem [resolvable:$true] %s1970_s30 }
 0x8cb   : > { %s3668_s24 = sshll.u32 %s3516_s5, 7  ;;  %s3669_s1 = sld [smem:[#allocation41_spill]] }
 0x8cc   : > { %s1950_s2 = scalar_lea.sflag [#allocation8], %s3291_s17  ;;  %s2890_s29 = scalar_lea.vmem %s3550_s30, 128 }
 0x8cd   : > { %p2891_p10 = scmp.ne.s32.totalorder %s3550_s30, %s2890_s29  ;;  %s3034_s5 = smov [#allocation18]  }
 0x8ce   : > { %s2894_s22 = sshll.u32 %s3034_s5, 4  ;;  %s2895_s22 = int_to_ptr.vmem [resolvable:$false] %s2894_s22 }
 0x8cf   : > { %p2892_p12 = pnand %p2891_p10, %p3666_p3  ;;  %s2896_s18 = scalar_lea.vmem %s2895_s22, 256 }
 0x8d0   : > { %v2278_v53 = vld [vmem:[%s3667_s0] ss:$0 sm:$0xff]  ;;  %p2897_p13 = scmp.lt.s32.totalorder %s3550_s30, %s2895_s22  ;;  %p2898_p2 = scmp.lt.s32.totalorder %s2896_s18, %s2890_s29 }
 0x8d1   : > { %s3670_s4 = smov %s3669_s1  ;;  %s3548_s16 = scalar_lea.hbm %s3669_s1, %s3668_s24 }
 0x8d2   : > { %p2893_p11 = pneg %p2892_p12  ;;  %p2899_p4 = por %p2898_p2, %p2897_p13 }
 0x8d4   : > { %p2900_p6 = pnand %p2899_p4, %p2893_p11 }
 0x97d   : > { %v1939_v54 = vpop.f32.mrf.mxu1 }
 0x97e   : > { %v1940_v55 = vadd.f32 %v2278_v53, %v1939_v54 }
 0x97f   : > { %v2464_v56 = vpop.f32.mrf.mxu1 }
 0x980   : > { %v1945_v57 = vadd.f32 %v1940_v55, %v3480_v11 }
 0x981   : > { %v1942_v58 = vpop.f32.mrf.mxu1 }
 0x982   : > { %1946 = vst.msk [vmem:[%s3306_s3] sm:$0xff] %vm1702_vm10, %v1945_v57 }
 0x983   : > { %v2465_v59 = vpop.f32.mrf.mxu1 }
 0x984   : > { %2903 = shalt.err (!%p2900_p6)
}
 0x985   : > { %s2904_s3 = scalar_lea.hbm %s3548_s16, 128  ;;  %s2908_s0 = scalar_lea.hbm %s3670_s4, 512 }
 0x986   : > { %p2905_p5 = scmp.ne.s32.totalorder %s3548_s16, %s2904_s3  ;;  %p2909_p1 = scmp.lt.s32.totalorder %s3548_s16, %s3670_s4 }
 0x987   : > { %p2910_p7 = scmp.lt.s32.totalorder %s2908_s0, %s2904_s3 }
 0x988   : > { %p2906_p8 = pnand %p2905_p5, %p3666_p3 }
 0x989   : > { %p2911_p9 = por %p2910_p7, %p2909_p1 }
 0x98a   : > { %p2907_p0 = pneg %p2906_p8 }
 0x98c   : > { %p2912_p10 = pnand %p2911_p9, %p2907_p0 }
 0x98e   : > { %2915 = shalt.err (!%p2912_p10)
}
 0x98f   : > { %2494 = dma.vmem_to_hbm [thread:$0]  (%p3666_p3), %s3550_s30, 128, %s3548_s16, %s1950_s2  }
 0x990 PF: > { %s3671_s23 = sld [smem:[#allocation32_spill]]  ;;  %p2541_p12 = scmp.ge.s32.totalorder %s3006_s20, 2 }
 0x991   : > { %s1997_s1 = sand.u32 1, %s2978_s27  }
 0x992   : > { %s1998_s29 = scalar_lea.sflag [#allocation8], %s1997_s1 }
 0x996   : > { %p3672_p11 = scmp.ne.s32.totalorder %s3671_s23, 0 }
 0x998   : > { %p2521_p13 = pnand %p2541_p12, %p3672_p11 }
 0x99a   : > { %p2522_p2 = pneg %p2521_p13 }
 0x99c   : > { %2969 = dma.done.wait (%p2522_p2), %s1998_s29, 128  }
 0x99d   : > { %2971 = vsyncadd (%p2522_p2), %s1998_s29, 4294967168  ;;  %s2007_s5 = scalar_lea.sflag [#allocation20], %s1997_s1 }
 0x99e   : > { %2973 = dma.done.wait (%p2522_p2), %s2007_s5, 128  }
 0x99f   : > { %2975 = vsyncadd (%p2522_p2), %s2007_s5, 4294967168  ;;  %s39_s20 = sadd.s32 1, %s3006_s20   ;;  %s3673_s26 = sld [smem:[#allocation27_spill]] }
 0x9a0   : > { %p36_p4 = scmp.ge.s32.totalorder %s39_s20, 6   ;;  %s3674_s29 = sld [smem:[#allocation33_spill]] }
 0x9a1   : > { %s3675_s30 = sld [smem:[#allocation28_spill]]  ;;  %s3679_s27 = smov %s2982_s28 }
 0x9a2   : > { %s3676_s0 = sld [smem:[#allocation29_spill]]  ;;  %38 = sbr.rel (!%p36_p4) target bundleno = 21 (0x15), region = 202 }
 0x9a3   : > { %s3677_s19 = sld [smem:[#allocation30_spill]] }
 0x9a4   : > { %s3678_s1 = sld [smem:[#allocation31_spill]] }
 0x9a5   : > { %s3680_s28 = smov %s3673_s26 }
 0x9a7   :  { %2012 = vsyncpa [#allocation7], 1 }
 0x9a8   :  { %2014 = vsyncpa [#allocation7 + $0x1], 1 }
 0x9a9   :  { %2015 = vsyncpa [#allocation10], 1 }
 0x9aa   :  { %2016 = vsyncpa [#allocation13], 1 }
 0x9ab   :  { %2017 = vsyncpa [#allocation16], 1 }
 0x9ac   :  { %2018 = vsyncpa [#allocation8], 1 }
 0x9ad   :  { %2020 = vsyncpa [#allocation8 + $0x1], 1 }
 0x9ae   :  { %2021 = vsyncpa [#allocation20], 1 }
 0x9af   :  { %2023 = vsyncpa [#allocation20 + $0x1], 1 }

</bundles_post_ra>
